<compile_context>
chip_gen: v7x
topology: tpu7x:2x2x1
jax: 0.10.0
libtpu: 0.0.40
codegen_flags: <defaults>
</compile_context>

<pallas_src>
import jax
import jax.numpy as jnp
from jax.experimental import pallas as pl
from jax.experimental.pallas import tpu as pltpu


# ----------------------------------------------------------------------------
# In-kernel helpers (f32 elementwise math).
# ----------------------------------------------------------------------------
def _gelu(v):
    # exact (erf) GELU == torch.nn.functional.gelu default
    return 0.5 * v * (1.0 + jax.lax.erf(v * 0.7071067811865476))


# ----------------------------------------------------------------------------
# Pallas kernel factory (closes over the real hidden width for LN statistics).
# ----------------------------------------------------------------------------
def _make_resnet_kernel(h_real):
    inv_h = 1.0 / float(h_real)

    def kernel(x_ref, mask_ref, shift_ref, pos_ref, wemb_ref, bemb_ref,
               c1w_ref, c2w_ref, ln_ref, aw_ref, ab_ref,
               res_out_ref, graph_out_ref, act_ref):
        layer = pl.program_id(1)
        n_layers = pl.num_programs(1)

        Bt, L, _ = x_ref.shape
        Hp = act_ref.shape[-1]          # lane-dense (padded) channel dim
        M = Bt * L

        mask = mask_ref[...].reshape(M, 1)              # (M,1) {0,1} f32
        sh = shift_ref[...]                             # (M,2) precomputed
        nf = sh[:, 0:1]                                 # not first residue
        nl = sh[:, 1:2]                                 # not last residue

        def layer_norm(v, g, b, eps=1e-5):
            # channel dim is zero-padded to Hp; statistics over the real H
            # channels only (padded lanes of v are exactly 0, and padded
            # gamma/beta are 0 so padded lanes stay exactly 0 afterwards).
            mu = jnp.sum(v, axis=-1, keepdims=True) * inv_h
            var = jnp.sum(v * v, axis=-1, keepdims=True) * inv_h - mu * mu
            return (v - mu) * jax.lax.rsqrt(var + eps) * g + b

        # ---- layer 0: embedding + sinusoidal position embedding ------------
        @pl.when(layer == 0)
        def _():
            xb = x_ref[...].reshape(M, -1).astype(jnp.bfloat16)
            h = jnp.dot(xb, wemb_ref[...], preferred_element_type=jnp.float32)
            h = h + bemb_ref[...]
            h = h.reshape(Bt, L, Hp) + pos_ref[...][None]
            act_ref[...] = h.reshape(M, Hp) * mask

        # ---- one ProteinResNetBlock (3 accumulating MXU matmuls per conv) --
        def conv(v, w_ref):
            # v: (M, Hp) f32 already masked; w_ref: (1, 3, Hp, Hp) bf16
            vb = v.astype(jnp.bfloat16)
            up = (pltpu.roll(v, shift=1, axis=0) * nf).astype(jnp.bfloat16)
            dn = (pltpu.roll(v, shift=M - 1, axis=0) * nl).astype(jnp.bfloat16)
            acc = jnp.dot(up, w_ref[0, 0], preferred_element_type=jnp.float32)
            acc = acc + jnp.dot(vb, w_ref[0, 1],
                                preferred_element_type=jnp.float32)
            acc = acc + jnp.dot(dn, w_ref[0, 2],
                                preferred_element_type=jnp.float32)
            return acc

        ln = ln_ref[0]                                   # (4, Hp) packed params
        layer_input = act_ref[...]                       # (M, Hp) f32
        t = conv(layer_input * mask, c1w_ref)
        t = layer_norm(t, ln[0:1], ln[1:2])
        t = _gelu(t)
        t = conv(t * mask, c2w_ref)
        t = layer_norm(t, ln[2:3], ln[3:4])
        t = _gelu(t + layer_input)
        act_ref[...] = t

        # ---- last layer: AttentionReadout + lane-dense output stores -------
        @pl.when(layer == n_layers - 1)
        def _():
            aw = aw_ref[...]                                           # (1,Hp)
            logits = jnp.sum(t * aw, axis=-1, keepdims=True) + ab_ref[...]
            logits = jnp.where(mask > 0, logits,
                               jnp.full_like(logits, -1e30))           # (M,1)
            lg = logits.reshape(Bt, L)                   # lane-dense softmax
            mx = jnp.max(lg, axis=-1, keepdims=True)
            p = jnp.exp(lg - mx)
            denom = jnp.sum(p, axis=-1, keepdims=True)
            attn = p * pl.reciprocal(denom, approx=True)               # (Bt,L)

            h3 = t.reshape(Bt, L, Hp)
            # attention pooling: VPU multiply + sublane reduce over L
            gf = jnp.sum(attn[:, :, None] * h3, axis=1)                # (Bt,Hp)

            res_out_ref[...] = h3.astype(res_out_ref.dtype)
            graph_out_ref[...] = gf.reshape(Bt, 1, Hp).astype(graph_out_ref.dtype)

    return kernel


# ----------------------------------------------------------------------------
# Wrapper.
# ----------------------------------------------------------------------------
def _pad_last(a, hp):
    h = a.shape[-1]
    if h == hp:
        return a
    pad = [(0, 0)] * (a.ndim - 1) + [(0, hp - h)]
    return jnp.pad(a, pad)


def protein_resnet_forward(x_padded, mask, pos_emb, params, block_batch=2,
                           out_dtype=jnp.float32,
                           vmem_limit_bytes=32 * 1024 * 1024):
    """x_padded: (B, L, D_in) f32, mask: (B, L, 1) f32 {0,1}.

    Returns (residue_padded (B, L, H) f32, graph_feature (B, H) f32).

    Perf knobs: on v7x keep block_batch small enough that
    act + 2x output blocks + 2x conv weights stay under ~48 MiB (optionally
    out_dtype=bf16); on v5e/v6e raise vmem_limit_bytes (64-96 MiB) and use a
    larger block_batch.  Keep B/block_batch even (>=4 ideally) for v7x's 2 TCs.
    """
    B, L, D_in = x_padded.shape
    H = params["w_emb"].shape[1]
    n_layers, K = params["conv1_w"].shape[:2]
    assert K == 3, "kernel assumes kernel_size=3, padding=1"
    Bt = block_batch
    assert B % Bt == 0, "batch must be divisible by block_batch"
    assert L % 8 == 0, "padded length must be a multiple of 8"
    nb = B // Bt
    M = Bt * L
    Hp = ((H + 127) // 128) * 128        # lane-dense channel dim, padded once

    # Host-side layout plumbing (free, done once):
    #  - pad the hidden dim of all params to Hp with zeros (padded channels
    #    then stay exactly 0 through the whole network),
    #  - pack the 4 LayerNorm params per block into one (n_layers, 4, Hp),
    #  - transpose attn_w to (1, Hp) for the VPU-reduce logits,
    #  - precompute per-protein conv boundary masks as one small (M, 2) array.
    w_emb = _pad_last(params["w_emb"], Hp)                      # (D_in,Hp) bf16
    b_emb = _pad_last(params["b_emb"], Hp)                      # (1,Hp) f32
    pos = _pad_last(pos_emb.astype(jnp.float32), Hp)            # (L,Hp) f32

    def pad_conv(w):                                            # (n,K,H,H)
        if H == Hp:
            return w
        out = jnp.zeros(w.shape[:2] + (Hp, Hp), w.dtype)
        return out.at[:, :, :H, :H].set(w)

    c1w = pad_conv(params["conv1_w"])                           # (n,K,Hp,Hp) bf16
    c2w = pad_conv(params["conv2_w"])
    ln = _pad_last(jnp.concatenate([params["ln1_g"], params["ln1_b"],
                                    params["ln2_g"], params["ln2_b"]],
                                   axis=1), Hp)                 # (n,4,Hp) f32
    aw = _pad_last(params["attn_w"].reshape(1, H), Hp)          # (1,Hp) f32
    ab = params["attn_b"].reshape(1, 1)                         # (1,1) f32

    pos_idx = jnp.arange(L)
    shift = jnp.stack([(pos_idx > 0), (pos_idx < L - 1)], axis=-1)
    shift = jnp.tile(shift.astype(jnp.float32), (Bt, 1))        # (M,2) f32

    def full(a):
        n = a.ndim
        return pl.BlockSpec(a.shape, lambda b, l, _n=n: (0,) * _n)

    def per_layer(a):
        n = a.ndim
        return pl.BlockSpec((1,) + a.shape[1:],
                            lambda b, l, _n=n: (l,) + (0,) * (_n - 1))

    res_p, graph_p = pl.pallas_call(
        _make_resnet_kernel(H),
        out_shape=(
            jax.ShapeDtypeStruct((B, L, Hp), out_dtype),
            jax.ShapeDtypeStruct((B, 1, Hp), out_dtype),
        ),
        grid=(nb, n_layers),
        in_specs=[
            pl.BlockSpec((Bt, L, D_in), lambda b, l: (b, 0, 0)),
            pl.BlockSpec((Bt, L, 1), lambda b, l: (b, 0, 0)),
            full(shift),
            full(pos),
            full(w_emb),
            full(b_emb),
            per_layer(c1w),
            per_layer(c2w),
            per_layer(ln),
            full(aw),
            full(ab),
        ],
        out_specs=(
            pl.BlockSpec((Bt, L, Hp), lambda b, l: (b, 0, 0)),
            pl.BlockSpec((Bt, 1, Hp), lambda b, l: (b, 0, 0)),
        ),
        scratch_shapes=[pltpu.VMEM((M, Hp), jnp.float32)],
        compiler_params=pltpu.CompilerParams(
            # layer axis MUST stay innermost + "arbitrary": the activation is
            # carried in scratch and re-initialized under pl.when(layer == 0).
            dimension_semantics=("parallel", "arbitrary"),
            vmem_limit_bytes=vmem_limit_bytes),
    )(x_padded, mask, shift, pos, w_emb, b_emb, c1w, c2w, ln, aw, ab)

    res = res_p[:, :, :H].astype(jnp.float32)
    graph = graph_p.reshape(B, Hp)[:, :H].astype(jnp.float32)
    return res, graph


# ----------------------------------------------------------------------------
# Glue (plain JAX): sinusoidal position embedding + pure-JAX reference.
# ----------------------------------------------------------------------------
def sinusoidal_position_embedding(L, H):
    inv_freq = 1.0 / (10000.0 ** (jnp.arange(0.0, H, 2.0, dtype=jnp.float32) / H))
    positions = jnp.arange(L - 1, -1, -1.0, dtype=jnp.float32)  # as in torchdrug
    sinusoid = jnp.outer(positions, inv_freq)
    return jnp.concatenate([jnp.sin(sinusoid), jnp.cos(sinusoid)], axis=-1)


def reference_forward(x_padded, mask, pos_emb, params):
    """Pure-JAX reference mirroring the PyTorch forward (same defaults).

    Matmul operands are cast to bf16 with f32 accumulation, matching the
    kernel's documented deviation from torch's pure-f32 matmuls."""
    bf16 = jnp.bfloat16

    def conv1d(v, w):               # v (B,L,C) f32, w (K,C,Co) bf16
        K = w.shape[0]
        pad = (K - 1) // 2
        vp = jnp.pad(v, ((0, 0), (pad, pad), (0, 0)))
        out = jnp.zeros(v.shape[:2] + (w.shape[2],), jnp.float32)
        for k in range(K):
            out = out + jnp.einsum(
                'blc,cd->bld', vp[:, k:k + v.shape[1]].astype(bf16), w[k],
                preferred_element_type=jnp.float32)
        return out

    def layer_norm(v, g, b):
        mu = jnp.mean(v, axis=-1, keepdims=True)
        var = jnp.mean((v - mu) ** 2, axis=-1, keepdims=True)
        return (v - mu) / jnp.sqrt(var + 1e-5) * g + b

    def gelu(v):
        return 0.5 * v * (1.0 + jax.lax.erf(v * 0.7071067811865476))

    h = jnp.einsum('bld,dh->blh', x_padded.astype(bf16), params["w_emb"],
                   preferred_element_type=jnp.float32)
    h = h + params["b_emb"] + pos_emb[None]
    h = h * mask
    n_layers = params["conv1_w"].shape[0]
    for i in range(n_layers):
        identity = h
        t = conv1d(h * mask, params["conv1_w"][i])
        t = layer_norm(t, params["ln1_g"][i], params["ln1_b"][i])
        t = gelu(t)
        t = conv1d(t * mask, params["conv2_w"][i])
        t = layer_norm(t, params["ln2_g"][i], params["ln2_b"][i])
        t = gelu(t + identity)
        h = t
    logits = h @ params["attn_w"] + params["attn_b"]
    logits = jnp.where(mask > 0, logits, -1e30)
    attn = jax.nn.softmax(logits, axis=1)
    graph = jnp.sum(attn * h, axis=1)
    return h, graph


if __name__ == "__main__":
    # Small synthetic protein batch (padded length multiple of 8; block_batch
    # chosen so nb = B/Bt = 4, even and >=2 tiles per TensorCore on v7x).
    B = 8
    lengths = [32, 25, 18, 30, 12, 27, 8, 21]     # graph.num_residues
    L = 32                                        # padded length
    D_in = 21                                     # padding_id = D_in - 1
    H = 32                                        # hidden_dims = [32, 32, 32]
    n_blocks = 2
    K = 3
    Bt = 2                                        # proteins per grid step
    total = sum(lengths)

    key = jax.random.PRNGKey(0)
    keys = jax.random.split(key, 8)

    # Synthetic graph.residue_feature (variadic, (total, D_in)).
    residue_feature = jax.random.normal(keys[0], (total, D_in), jnp.float32)

    # variadic_to_padded(value=padding_id) + mask (glue, not perf-critical).
    x_padded = jnp.full((B, L, D_in), float(D_in - 1), jnp.float32)
    mask = jnp.zeros((B, L, 1), jnp.float32)
    off = 0
    for b, n in enumerate(lengths):
        x_padded = x_padded.at[b, :n].set(residue_feature[off:off + n])
        mask = mask.at[b, :n, 0].set(1.0)
        off += n

    # Parameters (matmul weights stored bf16; LayerNorm / biases f32).
    params = {
        "w_emb": (jax.random.normal(keys[1], (D_in, H), jnp.float32) * 0.1
                  ).astype(jnp.bfloat16),
        "b_emb": jax.random.normal(keys[2], (1, H), jnp.float32) * 0.1,
        "conv1_w": (jax.random.normal(keys[3], (n_blocks, K, H, H), jnp.float32)
                    * (1.0 / jnp.sqrt(K * H))).astype(jnp.bfloat16),
        "ln1_g": jnp.ones((n_blocks, 1, H), jnp.float32),
        "ln1_b": jnp.zeros((n_blocks, 1, H), jnp.float32),
        "conv2_w": (jax.random.normal(keys[4], (n_blocks, K, H, H), jnp.float32)
                    * (1.0 / jnp.sqrt(K * H))).astype(jnp.bfloat16),
        "ln2_g": jnp.ones((n_blocks, 1, H), jnp.float32),
        "ln2_b": jnp.zeros((n_blocks, 1, H), jnp.float32),
        "attn_w": jax.random.normal(keys[5], (H, 1), jnp.float32) * 0.1,
        "attn_b": jnp.zeros((1, 1), jnp.float32),
    }

    pos_emb = sinusoidal_position_embedding(L, H)

    res_padded, graph_feature = protein_resnet_forward(
        x_padded, mask, pos_emb, params, block_batch=Bt)
    res_padded = jax.block_until_ready(res_padded)
    graph_feature = jax.block_until_ready(graph_feature)

    # padded_to_variadic: residue_feature of shape (|V_res|, H)
    residue_out = jnp.concatenate(
        [res_padded[b, :n] for b, n in enumerate(lengths)], axis=0)

    # Correctness check vs pure-JAX reference.
    ref_padded, ref_graph = reference_forward(x_padded, mask, pos_emb, params)
    ref_residue = jnp.concatenate(
        [ref_padded[b, :n] for b, n in enumerate(lengths)], axis=0)

    assert residue_out.shape == (total, H)
    assert graph_feature.shape == (B, H)
    assert jnp.allclose(residue_out, ref_residue, rtol=1e-2, atol=1e-2), (
        "residue_feature mismatch, max diff %g"
        % float(jnp.max(jnp.abs(residue_out - ref_residue))))
    assert jnp.allclose(graph_feature, ref_graph, rtol=1e-2, atol=1e-2), (
        "graph_feature mismatch, max diff %g"
        % float(jnp.max(jnp.abs(graph_feature - ref_graph))))

    print("KERNEL_OK")
</pallas_src>

<mosaic_0001>
module attributes {stable_mosaic.version = 11 : i64} {
  func.func @kernel(%arg0: i32, %arg1: i32, %arg2: memref<2x32x21xf32, #tpu.memory_space<vmem>>, %arg3: memref<2x32x1xf32, #tpu.memory_space<vmem>>, %arg4: memref<64x2xf32, #tpu.memory_space<vmem>>, %arg5: memref<32x128xf32, #tpu.memory_space<vmem>>, %arg6: memref<21x128xbf16, #tpu.memory_space<vmem>>, %arg7: memref<1x128xf32, #tpu.memory_space<vmem>>, %arg8: memref<1x3x128x128xbf16, #tpu.memory_space<vmem>>, %arg9: memref<1x3x128x128xbf16, #tpu.memory_space<vmem>>, %arg10: memref<1x4x128xf32, #tpu.memory_space<vmem>>, %arg11: memref<1x128xf32, #tpu.memory_space<vmem>>, %arg12: memref<1x1xf32, #tpu.memory_space<vmem>>, %arg13: memref<2x32x128xf32, #tpu.memory_space<vmem>>, %arg14: memref<2x1x128xf32, #tpu.memory_space<vmem>>, %arg15: memref<64x128xf32, #tpu.memory_space<vmem>>) attributes {dimension_semantics = [#tpu.dimension_semantics<parallel>, #tpu.dimension_semantics<arbitrary>], iteration_bounds = array<i64: 4, 2>, scalar_prefetch = 0 : i64, scratch_operands = 1 : i64, tpu.core_type = #tpu.core_type<tc>, window_params = [{transform_indices = @transform_0, window_bounds = array<i64: 2, 32, 21>}, {transform_indices = @transform_1, window_bounds = array<i64: 2, 32, 1>}, {pipeline_mode = #tpu.pipeline_mode<synchronous>, transform_indices = @transform_2, window_bounds = array<i64: 64, 2>}, {pipeline_mode = #tpu.pipeline_mode<synchronous>, transform_indices = @transform_3, window_bounds = array<i64: 32, 128>}, {pipeline_mode = #tpu.pipeline_mode<synchronous>, transform_indices = @transform_4, window_bounds = array<i64: 21, 128>}, {pipeline_mode = #tpu.pipeline_mode<synchronous>, transform_indices = @transform_5, window_bounds = array<i64: 1, 128>}, {transform_indices = @transform_6, window_bounds = array<i64: 1, 3, 128, 128>}, {transform_indices = @transform_7, window_bounds = array<i64: 1, 3, 128, 128>}, {transform_indices = @transform_8, window_bounds = array<i64: 1, 4, 128>}, {pipeline_mode = #tpu.pipeline_mode<synchronous>, transform_indices = @transform_9, window_bounds = array<i64: 1, 128>}, {pipeline_mode = #tpu.pipeline_mode<synchronous>, transform_indices = @transform_10, window_bounds = array<i64: 1, 1>}, {transform_indices = @transform_11, window_bounds = array<i64: 2, 32, 128>}, {transform_indices = @transform_12, window_bounds = array<i64: 2, 1, 128>}]} {
    %c0 = arith.constant 0 : index
    %c0_0 = arith.constant 0 : index
    %c0_1 = arith.constant 0 : index
    %0 = vector.load %arg3[%c0, %c0_0, %c0_1] : memref<2x32x1xf32, #tpu.memory_space<vmem>>, vector<2x32x1xf32>
    %1 = vector.shape_cast %0 : vector<2x32x1xf32> to vector<64x1xf32>
    %c0_2 = arith.constant 0 : index
    %c0_3 = arith.constant 0 : index
    %2 = vector.load %arg4[%c0_2, %c0_3] : memref<64x2xf32, #tpu.memory_space<vmem>>, vector<64x2xf32>
    %3 = vector.extract_strided_slice %2 {offsets = [0, 0], sizes = [64, 1], strides = [1, 1]} : vector<64x2xf32> to vector<64x1xf32>
    %4 = vector.extract_strided_slice %2 {offsets = [0, 1], sizes = [64, 1], strides = [1, 1]} : vector<64x2xf32> to vector<64x1xf32>
    %c0_i32 = arith.constant 0 : i32
    %5 = arith.cmpi eq, %arg1, %c0_i32 : i32
    %6 = arith.extui %5 : i1 to i32
    %c0_i32_4 = arith.constant 0 : i32
    %7 = arith.cmpi ne, %6, %c0_i32_4 : i32
    scf.if %7 {
      %c0_59 = arith.constant 0 : index
      %c0_60 = arith.constant 0 : index
      %c0_61 = arith.constant 0 : index
      %124 = vector.load %arg2[%c0_59, %c0_60, %c0_61] : memref<2x32x21xf32, #tpu.memory_space<vmem>>, vector<2x32x21xf32>
      %125 = vector.shape_cast %124 : vector<2x32x21xf32> to vector<64x21xf32>
      %126 = arith.truncf %125 : vector<64x21xf32> to vector<64x21xbf16>
      %c0_62 = arith.constant 0 : index
      %c0_63 = arith.constant 0 : index
      %127 = vector.load %arg6[%c0_62, %c0_63] : memref<21x128xbf16, #tpu.memory_space<vmem>>, vector<21x128xbf16>
      %cst_64 = arith.constant dense<0.000000e+00> : vector<64x128xf32>
      %128 = tpu.matmul %126, %127, %cst_64 {dimension_numbers = #tpu.dot_dimension_numbers<[1], [0], [0], [1], [0, 0, 1, 1], [], []>} : vector<64x21xbf16>, vector<21x128xbf16>, vector<64x128xf32> -> vector<64x128xf32>
      %c0_65 = arith.constant 0 : index
      %c0_66 = arith.constant 0 : index
      %129 = vector.load %arg7[%c0_65, %c0_66] : memref<1x128xf32, #tpu.memory_space<vmem>>, vector<1x128xf32>
      %130 = vector.broadcast %129 : vector<1x128xf32> to vector<64x128xf32>
      %131 = arith.addf %128, %130 : vector<64x128xf32>
      %132 = vector.shape_cast %131 : vector<64x128xf32> to vector<2x32x128xf32>
      %c0_67 = arith.constant 0 : index
      %c0_68 = arith.constant 0 : index
      %133 = vector.load %arg5[%c0_67, %c0_68] : memref<32x128xf32, #tpu.memory_space<vmem>>, vector<32x128xf32>
      %134 = vector.shape_cast %133 : vector<32x128xf32> to vector<1x32x128xf32>
      %135 = vector.broadcast %134 : vector<1x32x128xf32> to vector<2x32x128xf32>
      %136 = arith.addf %132, %135 : vector<2x32x128xf32>
      %137 = vector.shape_cast %136 : vector<2x32x128xf32> to vector<64x128xf32>
      %138 = vector.broadcast %1 : vector<64x1xf32> to vector<64x128xf32>
      %139 = arith.mulf %137, %138 : vector<64x128xf32>
      %c0_69 = arith.constant 0 : index
      %c0_70 = arith.constant 0 : index
      %140 = vector.load %arg15[%c0_69, %c0_70] : memref<64x128xf32, #tpu.memory_space<vmem>>, vector<64x128xf32>
      tpu.vector_store %arg15[%c0_69, %c0_70], %139 {strides = array<i32>} : memref<64x128xf32, #tpu.memory_space<vmem>>, vector<64x128xf32>,
    } else {
    }
    %c0_5 = arith.constant 0 : index
    %c0_6 = arith.constant 0 : index
    %c0_7 = arith.constant 0 : index
    %8 = vector.load %arg10[%c0_5, %c0_6, %c0_7] : memref<1x4x128xf32, #tpu.memory_space<vmem>>, vector<1x4x128xf32>
    %9 = vector.shape_cast %8 : vector<1x4x128xf32> to vector<4x128xf32>
    %c0_8 = arith.constant 0 : index
    %c0_9 = arith.constant 0 : index
    %10 = vector.load %arg15[%c0_8, %c0_9] : memref<64x128xf32, #tpu.memory_space<vmem>>, vector<64x128xf32>
    %11 = vector.broadcast %1 : vector<64x1xf32> to vector<64x128xf32>
    %12 = arith.mulf %10, %11 : vector<64x128xf32>
    %13 = arith.truncf %12 : vector<64x128xf32> to vector<64x128xbf16>
    %c1_i32 = arith.constant 1 : i32
    %14 = tpu.dynamic_rotate %12 by %c1_i32 dim 0 : vector<64x128xf32>, i32 -> vector<64x128xf32>
    %15 = vector.broadcast %3 : vector<64x1xf32> to vector<64x128xf32>
    %16 = arith.mulf %14, %15 : vector<64x128xf32>
    %17 = arith.truncf %16 : vector<64x128xf32> to vector<64x128xbf16>
    %c63_i32 = arith.constant 63 : i32
    %18 = tpu.dynamic_rotate %12 by %c63_i32 dim 0 : vector<64x128xf32>, i32 -> vector<64x128xf32>
    %19 = vector.broadcast %4 : vector<64x1xf32> to vector<64x128xf32>
    %20 = arith.mulf %18, %19 : vector<64x128xf32>
    %21 = arith.truncf %20 : vector<64x128xf32> to vector<64x128xbf16>
    %c0_10 = arith.constant 0 : index
    %c0_11 = arith.constant 0 : index
    %c0_12 = arith.constant 0 : index
    %c0_13 = arith.constant 0 : index
    %22 = vector.load %arg8[%c0_10, %c0_11, %c0_12, %c0_13] : memref<1x3x128x128xbf16, #tpu.memory_space<vmem>>, vector<1x1x128x128xbf16>
    %23 = vector.shape_cast %22 : vector<1x1x128x128xbf16> to vector<128x128xbf16>
    %cst = arith.constant dense<0.000000e+00> : vector<64x128xf32>
    %24 = tpu.matmul %17, %23, %cst {dimension_numbers = #tpu.dot_dimension_numbers<[1], [0], [0], [1], [0, 0, 1, 1], [], []>} : vector<64x128xbf16>, vector<128x128xbf16>, vector<64x128xf32> -> vector<64x128xf32>
    %c0_14 = arith.constant 0 : index
    %c1 = arith.constant 1 : index
    %c0_15 = arith.constant 0 : index
    %c0_16 = arith.constant 0 : index
    %25 = vector.load %arg8[%c0_14, %c1, %c0_15, %c0_16] : memref<1x3x128x128xbf16, #tpu.memory_space<vmem>>, vector<1x1x128x128xbf16>
    %26 = vector.shape_cast %25 : vector<1x1x128x128xbf16> to vector<128x128xbf16>
    %cst_17 = arith.constant dense<0.000000e+00> : vector<64x128xf32>
    %27 = tpu.matmul %13, %26, %cst_17 {dimension_numbers = #tpu.dot_dimension_numbers<[1], [0], [0], [1], [0, 0, 1, 1], [], []>} : vector<64x128xbf16>, vector<128x128xbf16>, vector<64x128xf32> -> vector<64x128xf32>
    %28 = arith.addf %24, %27 : vector<64x128xf32>
    %c0_18 = arith.constant 0 : index
    %c2 = arith.constant 2 : index
    %c0_19 = arith.constant 0 : index
    %c0_20 = arith.constant 0 : index
    %29 = vector.load %arg8[%c0_18, %c2, %c0_19, %c0_20] : memref<1x3x128x128xbf16, #tpu.memory_space<vmem>>, vector<1x1x128x128xbf16>
    %30 = vector.shape_cast %29 : vector<1x1x128x128xbf16> to vector<128x128xbf16>
    %cst_21 = arith.constant dense<0.000000e+00> : vector<64x128xf32>
    %31 = tpu.matmul %21, %30, %cst_21 {dimension_numbers = #tpu.dot_dimension_numbers<[1], [0], [0], [1], [0, 0, 1, 1], [], []>} : vector<64x128xbf16>, vector<128x128xbf16>, vector<64x128xf32> -> vector<64x128xf32>
    %32 = arith.addf %28, %31 : vector<64x128xf32>
    %33 = vector.extract_strided_slice %9 {offsets = [0, 0], sizes = [1, 128], strides = [1, 1]} : vector<4x128xf32> to vector<1x128xf32>
    %34 = vector.extract_strided_slice %9 {offsets = [1, 0], sizes = [1, 128], strides = [1, 1]} : vector<4x128xf32> to vector<1x128xf32>
    %cst_22 = arith.constant dense<0.000000e+00> : vector<64xf32>
    %35 = vector.multi_reduction <add>, %32, %cst_22 [1] : vector<64x128xf32> to vector<64xf32>
    %36 = vector.shape_cast %35 : vector<64xf32> to vector<64x1xf32>
    %cst_23 = arith.constant 3.125000e-02 : f32
    %37 = vector.broadcast %cst_23 : f32 to vector<64x1xf32>
    %38 = arith.mulf %36, %37 : vector<64x1xf32>
    %39 = arith.mulf %32, %32 : vector<64x128xf32>
    %cst_24 = arith.constant dense<0.000000e+00> : vector<64xf32>
    %40 = vector.multi_reduction <add>, %39, %cst_24 [1] : vector<64x128xf32> to vector<64xf32>
    %41 = vector.shape_cast %40 : vector<64xf32> to vector<64x1xf32>
    %cst_25 = arith.constant 3.125000e-02 : f32
    %42 = vector.broadcast %cst_25 : f32 to vector<64x1xf32>
    %43 = arith.mulf %41, %42 : vector<64x1xf32>
    %44 = arith.mulf %38, %38 : vector<64x1xf32>
    %45 = arith.subf %43, %44 : vector<64x1xf32>
    %46 = vector.broadcast %38 : vector<64x1xf32> to vector<64x128xf32>
    %47 = arith.subf %32, %46 : vector<64x128xf32>
    %cst_26 = arith.constant 9.99999974E-6 : f32
    %48 = vector.broadcast %cst_26 : f32 to vector<64x1xf32>
    %49 = arith.addf %45, %48 : vector<64x1xf32>
    %50 = math.rsqrt %49 : vector<64x1xf32>
    %51 = vector.broadcast %50 : vector<64x1xf32> to vector<64x128xf32>
    %52 = arith.mulf %47, %51 : vector<64x128xf32>
    %53 = vector.broadcast %33 : vector<1x128xf32> to vector<64x128xf32>
    %54 = arith.mulf %52, %53 : vector<64x128xf32>
    %55 = vector.broadcast %34 : vector<1x128xf32> to vector<64x128xf32>
    %56 = arith.addf %54, %55 : vector<64x128xf32>
    %cst_27 = arith.constant 5.000000e-01 : f32
    %57 = vector.broadcast %cst_27 : f32 to vector<64x128xf32>
    %58 = arith.mulf %57, %56 : vector<64x128xf32>
    %cst_28 = arith.constant 0.707106769 : f32
    %59 = vector.broadcast %cst_28 : f32 to vector<64x128xf32>
    %60 = arith.mulf %56, %59 : vector<64x128xf32>
    %61 = math.erf %60 : vector<64x128xf32>
    %cst_29 = arith.constant 1.000000e+00 : f32
    %62 = vector.broadcast %cst_29 : f32 to vector<64x128xf32>
    %63 = arith.addf %62, %61 : vector<64x128xf32>
    %64 = arith.mulf %58, %63 : vector<64x128xf32>
    %65 = vector.broadcast %1 : vector<64x1xf32> to vector<64x128xf32>
    %66 = arith.mulf %64, %65 : vector<64x128xf32>
    %67 = arith.truncf %66 : vector<64x128xf32> to vector<64x128xbf16>
    %c1_i32_30 = arith.constant 1 : i32
    %68 = tpu.dynamic_rotate %66 by %c1_i32_30 dim 0 : vector<64x128xf32>, i32 -> vector<64x128xf32>
    %69 = vector.broadcast %3 : vector<64x1xf32> to vector<64x128xf32>
    %70 = arith.mulf %68, %69 : vector<64x128xf32>
    %71 = arith.truncf %70 : vector<64x128xf32> to vector<64x128xbf16>
    %c63_i32_31 = arith.constant 63 : i32
    %72 = tpu.dynamic_rotate %66 by %c63_i32_31 dim 0 : vector<64x128xf32>, i32 -> vector<64x128xf32>
    %73 = vector.broadcast %4 : vector<64x1xf32> to vector<64x128xf32>
    %74 = arith.mulf %72, %73 : vector<64x128xf32>
    %75 = arith.truncf %74 : vector<64x128xf32> to vector<64x128xbf16>
    %c0_32 = arith.constant 0 : index
    %c0_33 = arith.constant 0 : index
    %c0_34 = arith.constant 0 : index
    %c0_35 = arith.constant 0 : index
    %76 = vector.load %arg9[%c0_32, %c0_33, %c0_34, %c0_35] : memref<1x3x128x128xbf16, #tpu.memory_space<vmem>>, vector<1x1x128x128xbf16>
    %77 = vector.shape_cast %76 : vector<1x1x128x128xbf16> to vector<128x128xbf16>
    %cst_36 = arith.constant dense<0.000000e+00> : vector<64x128xf32>
    %78 = tpu.matmul %71, %77, %cst_36 {dimension_numbers = #tpu.dot_dimension_numbers<[1], [0], [0], [1], [0, 0, 1, 1], [], []>} : vector<64x128xbf16>, vector<128x128xbf16>, vector<64x128xf32> -> vector<64x128xf32>
    %c0_37 = arith.constant 0 : index
    %c1_38 = arith.constant 1 : index
    %c0_39 = arith.constant 0 : index
    %c0_40 = arith.constant 0 : index
    %79 = vector.load %arg9[%c0_37, %c1_38, %c0_39, %c0_40] : memref<1x3x128x128xbf16, #tpu.memory_space<vmem>>, vector<1x1x128x128xbf16>
    %80 = vector.shape_cast %79 : vector<1x1x128x128xbf16> to vector<128x128xbf16>
    %cst_41 = arith.constant dense<0.000000e+00> : vector<64x128xf32>
    %81 = tpu.matmul %67, %80, %cst_41 {dimension_numbers = #tpu.dot_dimension_numbers<[1], [0], [0], [1], [0, 0, 1, 1], [], []>} : vector<64x128xbf16>, vector<128x128xbf16>, vector<64x128xf32> -> vector<64x128xf32>
    %82 = arith.addf %78, %81 : vector<64x128xf32>
    %c0_42 = arith.constant 0 : index
    %c2_43 = arith.constant 2 : index
    %c0_44 = arith.constant 0 : index
    %c0_45 = arith.constant 0 : index
    %83 = vector.load %arg9[%c0_42, %c2_43, %c0_44, %c0_45] : memref<1x3x128x128xbf16, #tpu.memory_space<vmem>>, vector<1x1x128x128xbf16>
    %84 = vector.shape_cast %83 : vector<1x1x128x128xbf16> to vector<128x128xbf16>
    %cst_46 = arith.constant dense<0.000000e+00> : vector<64x128xf32>
    %85 = tpu.matmul %75, %84, %cst_46 {dimension_numbers = #tpu.dot_dimension_numbers<[1], [0], [0], [1], [0, 0, 1, 1], [], []>} : vector<64x128xbf16>, vector<128x128xbf16>, vector<64x128xf32> -> vector<64x128xf32>
    %86 = arith.addf %82, %85 : vector<64x128xf32>
    %87 = vector.extract_strided_slice %9 {offsets = [2, 0], sizes = [1, 128], strides = [1, 1]} : vector<4x128xf32> to vector<1x128xf32>
    %88 = vector.extract_strided_slice %9 {offsets = [3, 0], sizes = [1, 128], strides = [1, 1]} : vector<4x128xf32> to vector<1x128xf32>
    %cst_47 = arith.constant dense<0.000000e+00> : vector<64xf32>
    %89 = vector.multi_reduction <add>, %86, %cst_47 [1] : vector<64x128xf32> to vector<64xf32>
    %90 = vector.shape_cast %89 : vector<64xf32> to vector<64x1xf32>
    %cst_48 = arith.constant 3.125000e-02 : f32
    %91 = vector.broadcast %cst_48 : f32 to vector<64x1xf32>
    %92 = arith.mulf %90, %91 : vector<64x1xf32>
    %93 = arith.mulf %86, %86 : vector<64x128xf32>
    %cst_49 = arith.constant dense<0.000000e+00> : vector<64xf32>
    %94 = vector.multi_reduction <add>, %93, %cst_49 [1] : vector<64x128xf32> to vector<64xf32>
    %95 = vector.shape_cast %94 : vector<64xf32> to vector<64x1xf32>
    %cst_50 = arith.constant 3.125000e-02 : f32
    %96 = vector.broadcast %cst_50 : f32 to vector<64x1xf32>
    %97 = arith.mulf %95, %96 : vector<64x1xf32>
    %98 = arith.mulf %92, %92 : vector<64x1xf32>
    %99 = arith.subf %97, %98 : vector<64x1xf32>
    %100 = vector.broadcast %92 : vector<64x1xf32> to vector<64x128xf32>
    %101 = arith.subf %86, %100 : vector<64x128xf32>
    %cst_51 = arith.constant 9.99999974E-6 : f32
    %102 = vector.broadcast %cst_51 : f32 to vector<64x1xf32>
    %103 = arith.addf %99, %102 : vector<64x1xf32>
    %104 = math.rsqrt %103 : vector<64x1xf32>
    %105 = vector.broadcast %104 : vector<64x1xf32> to vector<64x128xf32>
    %106 = arith.mulf %101, %105 : vector<64x128xf32>
    %107 = vector.broadcast %87 : vector<1x128xf32> to vector<64x128xf32>
    %108 = arith.mulf %106, %107 : vector<64x128xf32>
    %109 = vector.broadcast %88 : vector<1x128xf32> to vector<64x128xf32>
    %110 = arith.addf %108, %109 : vector<64x128xf32>
    %111 = arith.addf %110, %10 : vector<64x128xf32>
    %cst_52 = arith.constant 5.000000e-01 : f32
    %112 = vector.broadcast %cst_52 : f32 to vector<64x128xf32>
    %113 = arith.mulf %112, %111 : vector<64x128xf32>
    %cst_53 = arith.constant 0.707106769 : f32
    %114 = vector.broadcast %cst_53 : f32 to vector<64x128xf32>
    %115 = arith.mulf %111, %114 : vector<64x128xf32>
    %116 = math.erf %115 : vector<64x128xf32>
    %cst_54 = arith.constant 1.000000e+00 : f32
    %117 = vector.broadcast %cst_54 : f32 to vector<64x128xf32>
    %118 = arith.addf %117, %116 : vector<64x128xf32>
    %119 = arith.mulf %113, %118 : vector<64x128xf32>
    %c0_55 = arith.constant 0 : index
    %c0_56 = arith.constant 0 : index
    %120 = vector.load %arg15[%c0_55, %c0_56] : memref<64x128xf32, #tpu.memory_space<vmem>>, vector<64x128xf32>
    tpu.vector_store %arg15[%c0_55, %c0_56], %119 {strides = array<i32>} : memref<64x128xf32, #tpu.memory_space<vmem>>, vector<64x128xf32>,
    %c1_i32_57 = arith.constant 1 : i32
    %121 = arith.cmpi eq, %arg1, %c1_i32_57 : i32
    %122 = arith.extui %121 : i1 to i32
    %c0_i32_58 = arith.constant 0 : i32
    %123 = arith.cmpi ne, %122, %c0_i32_58 : i32
    scf.if %123 {
      %c0_59 = arith.constant 0 : index
      %c0_60 = arith.constant 0 : index
      %124 = vector.load %arg11[%c0_59, %c0_60] : memref<1x128xf32, #tpu.memory_space<vmem>>, vector<1x128xf32>
      %125 = vector.broadcast %124 : vector<1x128xf32> to vector<64x128xf32>
      %126 = arith.mulf %119, %125 : vector<64x128xf32>
      %cst_61 = arith.constant dense<0.000000e+00> : vector<64xf32>
      %127 = vector.multi_reduction <add>, %126, %cst_61 [1] : vector<64x128xf32> to vector<64xf32>
      %128 = vector.shape_cast %127 : vector<64xf32> to vector<64x1xf32>
      %c0_62 = arith.constant 0 : index
      %c0_63 = arith.constant 0 : index
      %129 = vector.load %arg12[%c0_62, %c0_63] : memref<1x1xf32, #tpu.memory_space<vmem>>, vector<1x1xf32>
      %130 = vector.broadcast %129 : vector<1x1xf32> to vector<64x1xf32>
      %131 = arith.addf %128, %130 : vector<64x1xf32>
      %cst_64 = arith.constant 0.000000e+00 : f32
      %132 = vector.broadcast %cst_64 : f32 to vector<64x1xf32>
      %133 = arith.cmpf ogt, %1, %132 : vector<64x1xf32>
      %cst_65 = arith.constant -1.000000e+30 : f32
      %134 = vector.broadcast %cst_65 : f32 to vector<64x1xf32>
      %135 = arith.select %133, %131, %134 : vector<64x1xi1>, vector<64x1xf32>
      %136 = vector.shape_cast %135 : vector<64x1xf32> to vector<2x32xf32>
      %cst_66 = arith.constant dense<0xFF800000> : vector<2xf32>
      %137 = vector.multi_reduction <maximumf>, %136, %cst_66 [1] : vector<2x32xf32> to vector<2xf32>
      %138 = vector.shape_cast %137 : vector<2xf32> to vector<2x1xf32>
      %139 = vector.broadcast %138 : vector<2x1xf32> to vector<2x32xf32>
      %140 = arith.subf %136, %139 : vector<2x32xf32>
      %141 = math.exp %140 : vector<2x32xf32>
      %cst_67 = arith.constant dense<0.000000e+00> : vector<2xf32>
      %142 = vector.multi_reduction <add>, %141, %cst_67 [1] : vector<2x32xf32> to vector<2xf32>
      %143 = vector.shape_cast %142 : vector<2xf32> to vector<2x1xf32>
      %144 = tpu.reciprocal %143 {approx = true} : vector<2x1xf32> -> vector<2x1xf32>
      %145 = vector.broadcast %144 : vector<2x1xf32> to vector<2x32xf32>
      %146 = arith.mulf %141, %145 : vector<2x32xf32>
      %147 = vector.shape_cast %119 : vector<64x128xf32> to vector<2x32x128xf32>
      %148 = vector.shape_cast %146 : vector<2x32xf32> to vector<2x32x1xf32>
      %149 = vector.broadcast %148 : vector<2x32x1xf32> to vector<2x32x128xf32>
      %150 = arith.mulf %149, %147 : vector<2x32x128xf32>
      %cst_68 = arith.constant dense<0.000000e+00> : vector<2x128xf32>
      %151 = vector.multi_reduction <add>, %150, %cst_68 [1] : vector<2x32x128xf32> to vector<2x128xf32>
      %c0_69 = arith.constant 0 : index
      %c0_70 = arith.constant 0 : index
      %c0_71 = arith.constant 0 : index
      %152 = vector.load %arg13[%c0_69, %c0_70, %c0_71] : memref<2x32x128xf32, #tpu.memory_space<vmem>>, vector<2x32x128xf32>
      tpu.vector_store %arg13[%c0_69, %c0_70, %c0_71], %147 {strides = array<i32>} : memref<2x32x128xf32, #tpu.memory_space<vmem>>, vector<2x32x128xf32>,
      %153 = vector.shape_cast %151 : vector<2x128xf32> to vector<2x1x128xf32>
      %c0_72 = arith.constant 0 : index
      %c0_73 = arith.constant 0 : index
      %c0_74 = arith.constant 0 : index
      %154 = vector.load %arg14[%c0_72, %c0_73, %c0_74] : memref<2x1x128xf32, #tpu.memory_space<vmem>>, vector<2x1x128xf32>
      tpu.vector_store %arg14[%c0_72, %c0_73, %c0_74], %153 {strides = array<i32>} : memref<2x1x128xf32, #tpu.memory_space<vmem>>, vector<2x1x128xf32>,
    } else {
    }
    return
  }
  func.func @transform_0(%arg0: i32, %arg1: i32) -> (i32, i32, i32) {
    %c0_i32 = arith.constant 0 : i32
    %c0_i32_0 = arith.constant 0 : i32
    %c0_i32_1 = arith.constant 0 : i32
    return %arg0, %c0_i32, %c0_i32_0 : i32, i32, i32
  }
  func.func @transform_1(%arg0: i32, %arg1: i32) -> (i32, i32, i32) {
    %c0_i32 = arith.constant 0 : i32
    %c0_i32_0 = arith.constant 0 : i32
    %c0_i32_1 = arith.constant 0 : i32
    return %arg0, %c0_i32, %c0_i32_0 : i32, i32, i32
  }
  func.func @transform_2(%arg0: i32, %arg1: i32) -> (i32, i32) {
    %c0_i32 = arith.constant 0 : i32
    %c0_i32_0 = arith.constant 0 : i32
    %c0_i32_1 = arith.constant 0 : i32
    return %c0_i32, %c0_i32_0 : i32, i32
  }
  func.func @transform_3(%arg0: i32, %arg1: i32) -> (i32, i32) {
    %c0_i32 = arith.constant 0 : i32
    %c0_i32_0 = arith.constant 0 : i32
    %c0_i32_1 = arith.constant 0 : i32
    return %c0_i32, %c0_i32_0 : i32, i32
  }
  func.func @transform_4(%arg0: i32, %arg1: i32) -> (i32, i32) {
    %c0_i32 = arith.constant 0 : i32
    %c0_i32_0 = arith.constant 0 : i32
    %c0_i32_1 = arith.constant 0 : i32
    return %c0_i32, %c0_i32_0 : i32, i32
  }
  func.func @transform_5(%arg0: i32, %arg1: i32) -> (i32, i32) {
    %c0_i32 = arith.constant 0 : i32
    %c0_i32_0 = arith.constant 0 : i32
    %c0_i32_1 = arith.constant 0 : i32
    return %c0_i32, %c0_i32_0 : i32, i32
  }
  func.func @transform_6(%arg0: i32, %arg1: i32) -> (i32, i32, i32, i32) {
    %c0_i32 = arith.constant 0 : i32
    %c0_i32_0 = arith.constant 0 : i32
    %c0_i32_1 = arith.constant 0 : i32
    %c0_i32_2 = arith.constant 0 : i32
    return %arg1, %c0_i32, %c0_i32_0, %c0_i32_1 : i32, i32, i32, i32
  }
  func.func @transform_7(%arg0: i32, %arg1: i32) -> (i32, i32, i32, i32) {
    %c0_i32 = arith.constant 0 : i32
    %c0_i32_0 = arith.constant 0 : i32
    %c0_i32_1 = arith.constant 0 : i32
    %c0_i32_2 = arith.constant 0 : i32
    return %arg1, %c0_i32, %c0_i32_0, %c0_i32_1 : i32, i32, i32, i32
  }
  func.func @transform_8(%arg0: i32, %arg1: i32) -> (i32, i32, i32) {
    %c0_i32 = arith.constant 0 : i32
    %c0_i32_0 = arith.constant 0 : i32
    %c0_i32_1 = arith.constant 0 : i32
    return %arg1, %c0_i32, %c0_i32_0 : i32, i32, i32
  }
  func.func @transform_9(%arg0: i32, %arg1: i32) -> (i32, i32) {
    %c0_i32 = arith.constant 0 : i32
    %c0_i32_0 = arith.constant 0 : i32
    %c0_i32_1 = arith.constant 0 : i32
    return %c0_i32, %c0_i32_0 : i32, i32
  }
  func.func @transform_10(%arg0: i32, %arg1: i32) -> (i32, i32) {
    %c0_i32 = arith.constant 0 : i32
    %c0_i32_0 = arith.constant 0 : i32
    %c0_i32_1 = arith.constant 0 : i32
    return %c0_i32, %c0_i32_0 : i32, i32
  }
  func.func @transform_11(%arg0: i32, %arg1: i32) -> (i32, i32, i32) {
    %c0_i32 = arith.constant 0 : i32
    %c0_i32_0 = arith.constant 0 : i32
    %c0_i32_1 = arith.constant 0 : i32
    return %arg0, %c0_i32, %c0_i32_0 : i32, i32, i32
  }
  func.func @transform_12(%arg0: i32, %arg1: i32) -> (i32, i32, i32) {
    %c0_i32 = arith.constant 0 : i32
    %c0_i32_0 = arith.constant 0 : i32
    %c0_i32_1 = arith.constant 0 : i32
    return %arg0, %c0_i32, %c0_i32_0 : i32, i32, i32
  }
}

</mosaic_0001>

<bundles_post_ra>
// kernel: tpu_custom_call.1
= control target key start
LH: loop header
LB: loop body
LE: loop exit
PB: predicated region body
PF: predicated region fallthrough
CT: control target
= control target key end

     0   :  { %s4802_s0 = inlined_call_operand.vmem [shape: f32[8,32,21], index: 0, kind: input, shape index: {}]   ;;  %s4803_s1 = inlined_call_operand.vmem [shape: f32[8,32,1], index: 1, kind: input, shape index: {}]   ;;  %s4804_s2 = inlined_call_operand.vmem [shape: f32[64,2], index: 2, kind: input, shape index: {}]   ;;  %s4805_s3 = inlined_call_operand.hbm [shape: f32[32,128], index: 3, kind: input, shape index: {}]   ;;  %s4806_s4 = inlined_call_operand.hbm [shape: bf16[21,128], index: 4, kind: input, shape index: {}]   ;;  %s4807_s5 = inlined_call_operand.hbm [shape: f32[1,128], index: 5, kind: input, shape index: {}]   ;;  %s4808_s6 = inlined_call_operand.vmem [shape: bf16[2,3,128,128], index: 6, kind: input, shape index: {}]   ;;  %s4809_s7 = inlined_call_operand.vmem [shape: bf16[2,3,128,128], index: 7, kind: input, shape index: {}]   ;;  %s4810_s8 = inlined_call_operand.vmem [shape: f32[2,4,128], index: 8, kind: input, shape index: {}]   ;;  %s4811_s9 = inlined_call_operand.vmem [shape: f32[1,128], index: 9, kind: input, shape index: {}]   ;;  %s4812_s10 = inlined_call_operand.<no memory space> [shape: f32[1,1], index: 10, kind: input, shape index: {}]   ;;  %s4813_s11 = inlined_call_operand.hbm [shape: f32[8,32,128], index: 11, kind: output, shape index: {0}]   ;;  %s4814_s12 = inlined_call_operand.hbm [shape: f32[8,1,128], index: 12, kind: output, shape index: {1}]  }
   0x1   :  { %4843 = sst [smem:[#allocation36_spill]] %s4813_s11  ;;  %v18_v0 = vstv %s4812_s10 }
   0x2   :  { %4844 = sst [smem:[#allocation37_spill]] %s4814_s12  ;;  %19 = vst [vmem:[#allocation3] sm:$0x1] %v18_v0 }
   0x3   :  { %20 = vsyncpa [#allocation5], 0 }
   0x4   :  { %21 = vsyncpa [#allocation8], 0 }
   0x5   :  { %22 = vsyncpa [#allocation6], 0 }
   0x6   :  { %24 = vsyncpa [#allocation6 + $0x1], 0 }
   0x7   :  { %25 = vsyncpa [#allocation12], 0 }
   0x8   :  { %27 = vsyncpa [#allocation12 + $0x1], 0  ;;  %s3761_s23 = smov 0   ;;  %s3763_s24 = smov 0  }
   0x9   :  { %s3765_s25 = smov 0   ;;  %s3767_s26 = smov 0  }
   0xa   :  { %s3769_s27 = smov 0   ;;  %s3771_s28 = smov 0  }
   0xb   :  { %s3773_s10 = smov 0   ;;  %s3775_s29 = smov 0  }
   0xc LB: > { %4845 = sst [smem:[#allocation17_spill]] %s3645_s23  ;;  %s2757_s30 = sadd.s32 4294967295, %s3673_s29   ;;  %s3673_s29 = sphi %s3775_s29, %s33_s29   ;;  %s3669_s10 = sphi %s3773_s10, %s4895_s10   ;;  %s3665_s28 = sphi %s3771_s28, %s4894_s28   ;;  %s3661_s27 = sphi %s3769_s27, %s4893_s27   ;;  %s3657_s26 = sphi %s3767_s26, %s4892_s26   ;;  %s3653_s25 = sphi %s3765_s25, %s4891_s25   ;;  %s3649_s24 = sphi %s3763_s24, %s4897_s24   ;;  %s3645_s23 = sphi %s3761_s23, %s4896_s23  }
   0xd   : > { %4846 = sst [smem:[#allocation18_spill]] %s3653_s25  ;;  %s2758_s13 = sadd.s32 4294967294, %s3673_s29  }
   0xe   : > { %4847 = sst [smem:[#allocation19_spill]] %s3665_s28  ;;  %s42_s14 = sadd.s32 1, %s3665_s28 }
   0xf   : > { %4848 = sst [smem:[#allocation20_spill]] %s3669_s10  ;;  %s45_s15 = sadd.s32 1, %s3669_s10 }
  0x10   : > { %4849 = sst [smem:[#allocation21_spill]] %s3673_s29  ;;  %p43_p0 = scmp.ge.s32.totalorder %s42_s14, 2 }
  0x11   : > { %s308_s16 = sadd.s32 1, %s3653_s25  ;;  %p318_p1 = scmp.ne.s32.totalorder %s3653_s25, %s3649_s24 }
  0x12   : > { %p319_p2 = scmp.eq.s32.totalorder %s2757_s30, 7  ;;  %s4899_s14 = smov (%p43_p0, %s42_s14), 0 }
  0x13   : > { %4850 = sst [smem:[#allocation22_spill]] %s4899_s14  ;;  %s4901_s15 = smov (!%p43_p0, %s45_s15), %s3669_s10 }
  0x14   : > { %p3811_p3 = por %p319_p2, %p318_p1  ;;  %p324_p4 = scmp.ne.s32.totalorder %s3649_s24, %s3645_s23 }
  0x15   : > { %p47_p5 = scmp.ge.s32.totalorder %s4901_s15, 4  ;;  %p325_p6 = scmp.eq.s32.totalorder %s2758_s13, 7 }
  0x16   : > { %s4851_s17 = scalar_select %p3811_p3, 1, 0 }
  0x17   : > { %p2759_p7 = scmp.ge.s32.totalorder %s3673_s29, 1  ;;  %p358_p8 = scmp.lt.s32.totalorder %s3673_s29, 9 }
  0x18   : > { %4852 = sst [smem:[#allocation23_spill]] %s4851_s17  ;;  %s4903_s15 = smov (%p47_p5, %s4901_s15), 0 }
  0x19   : > { %4853 = sst [smem:[#allocation24_spill]] %s4903_s15  ;;  %p3821_p9 = por %p325_p6, %p324_p4 }
  0x1a   : > { %p3825_p10 = pnand %p2759_p7, %p358_p8  ;;  %s305_s20 = ssub.s32 %s3669_s10, %s4903_s15 }
  0x1b   : > { %s4854_s18 = scalar_select %p3821_p9, 1, 0 }
  0x1c   : > { %s4856_s19 = scalar_select %p3825_p10, 1, 0 }
  0x1d   : > { %4855 = sst [smem:[#allocation25_spill]] %s4854_s18  ;;  %p306_p11 = scmp.eq.s32.totalorder %s305_s20, 0 }
  0x1e   : > { %p3203_p12 = pneg %p3825_p10  ;;  %p3833_p13 = scmp.eq.s32.totalorder %s2757_s30, 0 }
  0x1f   : > { %s3838_s22 = scalar_select %p306_p11, %s3653_s25, %s308_s16  }
  0x20   : > { %s4857_s21 = scalar_select %p3833_p13, 1, 0 }
  0x21   : > { %4858 = sst [smem:[#allocation26_spill]] %s3838_s22  ;;  %p3842_p0 = pnand %p3833_p13, %p3203_p12 }
  0x22   : > { %s3675_s14 = smov [#allocation7]   ;;  %s3455_s10 = scalar_lea.hbm %s4806_s4, 192 }
  0x23   : > { %s386_s28 = sshll.u32 %s3675_s14, 4  ;;  %p3456_p1 = scmp.ne.s32.totalorder %s4806_s4, %s3455_s10  ;;  %s387_s28 = int_to_ptr.vmem [resolvable:$true] %s386_s28 }
  0x24   : > { %p3854_p2 = pneg %p3842_p0  ;;  %p3462_p6 = scmp.lt.u32.totalorder %s3455_s10, %s4806_s4 }
  0x26   : > { %p3458_p4 = pnand %p3854_p2, %p3456_p1 }
  0x28   : > { %p3459_p5 = pneg %p3458_p4 }
  0x2a   : > { %p3464_p7 = pnand %p3462_p6, %p3459_p5 }
  0x2c   : > { %3467 = shalt.err (!%p3464_p7)
}
  0x2d   : > { %s3468_s15 = scalar_lea.vmem %s387_s28, 192  ;;  %p3476_p9 = scmp.lt.s32.totalorder %s387_s28, %s387_s28 }
  0x2e   : > { %p3469_p8 = scmp.ne.s32.totalorder %s387_s28, %s3468_s15  ;;  %p3477_p3 = scmp.lt.s32.totalorder %s3468_s15, %s3468_s15 }
  0x30   : > { %p3471_p11 = pnand %p3469_p8, %p3854_p2  ;;  %p3478_p13 = por %p3477_p3, %p3476_p9 }
  0x32   : > { %p3472_p12 = pneg %p3471_p11 }
  0x34   : > { %p3479_p10 = pnand %p3478_p13, %p3472_p12 }
  0x36   : > { %3482 = shalt.err (!%p3479_p10)
}
  0x37   : > { %s3676_s18 = smov 64   ;;  %s3677_s20 = smov 4  }
  0x38   : > { %3209 = dma.hbm_to_vmem [thread:$0]  (!%p3842_p0), %s4806_s4, 192, %s387_s28, [#allocation8], %s3676_s18, %s3676_s18, %s3677_s20  }
  0x39   : > { %s3678_s30 = smov [#allocation4]   ;;  %s3483_s29 = scalar_lea.hbm %s4805_s3, 512 }
  0x3a   : > { %s373_s14 = sshll.u32 %s3678_s30, 4  ;;  %p3484_p3 = scmp.ne.s32.totalorder %s4805_s3, %s3483_s29  ;;  %s374_s14 = int_to_ptr.vmem [resolvable:$true] %s373_s14 }
  0x3b   : > { %p3490_p13 = scmp.lt.u32.totalorder %s3483_s29, %s4805_s3 }
  0x3c   : > { %p3486_p9 = pnand %p3484_p3, %p3854_p2 }
  0x3e   : > { %p3487_p10 = pneg %p3486_p9 }
  0x40   : > { %p3492_p1 = pnand %p3490_p13, %p3487_p10 }
  0x42   : > { %3495 = shalt.err (!%p3492_p1)
}
  0x43   : > { %s3496_s28 = scalar_lea.vmem %s374_s14, 512  ;;  %p3504_p7 = scmp.lt.s32.totalorder %s374_s14, %s374_s14 }
  0x44   : > { %p3497_p4 = scmp.ne.s32.totalorder %s374_s14, %s3496_s28  ;;  %p3505_p8 = scmp.lt.s32.totalorder %s3496_s28, %s3496_s28 }
  0x46   : > { %p3499_p5 = pnand %p3497_p4, %p3854_p2  ;;  %p3506_p11 = por %p3505_p8, %p3504_p7 }
  0x48   : > { %p3500_p6 = pneg %p3499_p5 }
  0x4a   : > { %p3507_p12 = pnand %p3506_p11, %p3500_p6 }
  0x4c   : > { %3510 = shalt.err (!%p3507_p12)
}
  0x4d   : > { %s3679_s12 = smov 128   ;;  %s3680_s23 = smov 8  }
  0x4e   : > { %3206 = dma.hbm_to_vmem [thread:$0]  (!%p3842_p0), %s4805_s3, 512, %s374_s14, [#allocation5], %s3679_s12, %s3679_s12, %s3680_s23  }
  0x4f   : > { %s3681_s29 = smov [#allocation9]   ;;  %s3511_s22 = scalar_lea.hbm %s4807_s5, 16 }
  0x50   : > { %s400_s17 = sshll.u32 %s3681_s29, 4  ;;  %p3512_p3 = scmp.ne.s32.totalorder %s4807_s5, %s3511_s22  ;;  %s401_s17 = int_to_ptr.vmem [resolvable:$true] %s400_s17 }
  0x51   : > { %p3518_p13 = scmp.lt.u32.totalorder %s3511_s22, %s4807_s5 }
  0x52   : > { %p3514_p9 = pnand %p3512_p3, %p3854_p2 }
  0x54   : > { %p3515_p10 = pneg %p3514_p9 }
  0x56   : > { %p3520_p1 = pnand %p3518_p13, %p3515_p10 }
  0x58   : > { %3523 = shalt.err (!%p3520_p1)
}
  0x59   : > { %s3524_s14 = scalar_lea.vmem %s401_s17, 16  ;;  %s3531_s12 = scalar_lea.vmem %s401_s17, 32 }
  0x5a   : > { %p3525_p4 = scmp.ne.s32.totalorder %s401_s17, %s3524_s14  ;;  %p3532_p7 = scmp.lt.s32.totalorder %s401_s17, %s401_s17 }
  0x5b   : > { %p3533_p8 = scmp.lt.s32.totalorder %s3531_s12, %s3524_s14 }
  0x5c   : > { %p3527_p5 = pnand %p3525_p4, %p3854_p2 }
  0x5d   : > { %p3534_p11 = por %p3533_p8, %p3532_p7 }
  0x5e   : > { %p3528_p6 = pneg %p3527_p5 }
  0x60   : > { %p3535_p12 = pnand %p3534_p11, %p3528_p6 }
  0x62   : > { %3538 = shalt.err (!%p3535_p12)
}
  0x63   : > { %3212 = dma.hbm_to_vmem [thread:$0]  (!%p3842_p0), %s4807_s5, 16, %s401_s17, [#allocation8]  }
  0x64   : > { %p4861_p3 = scmp.ne.s32.totalorder %s4856_s19, 0 }
  0x66   : > { %462 = sbr.rel (%p4861_p3) target bundleno = 2454 (0x996), region = 64 }
  0x6d   : > { %p4862_p9 = scmp.ne.s32.totalorder %s4857_s21, 0 }
  0x6f   : > { %3628 = dma.done.wait (%p4862_p9), [#allocation5], 512  }
  0x70   : > { %3630 = vsyncadd (%p4862_p9), [#allocation5], 4294966784 }
  0x71   : > { %3632 = dma.done.wait (%p4862_p9), [#allocation8], 208  }
  0x72   : > { %3634 = vsyncadd (%p4862_p9), [#allocation8], 4294967088  ;;  %s2770_s13 = sshll.u32 %s3661_s27, 1  ;;  %s3918_s16 = sand.u32 1, %s3649_s24   ;;  %v3951_v9 = vld [vmem:[%s4804_s2] sm:$0xff]  ;;  %v3956_v10 = vld [vmem:[%s4804_s2 + $0x8] sm:$0xff] }
  0x73   : > { %p539_p0 = scmp.lt.s32.totalorder %s2770_s13, 7  ;;  %s2768_s19 = sshll.u32 %s3918_s16, 6  ;;  %v3961_v11 = vld [vmem:[%s4804_s2 + $0x10] sm:$0xff]  ;;  %v3966_v12 = vld [vmem:[%s4804_s2 + $0x18] sm:$0xff]  ;;  %v3976_v13 = vld [vmem:[%s4804_s2 + $0x20] sm:$0xff] }
  0x74   : > { %s2769_s25 = sshll.u32 %s3918_s16, 1  ;;  %p552_p2 = scmp.lt.s32.totalorder %s3657_s26, 1  ;;  %v3981_v14 = vld [vmem:[%s4804_s2 + $0x28] sm:$0xff]  ;;  %v3986_v15 = vld [vmem:[%s4804_s2 + $0x30] sm:$0xff]  ;;  %v4001_v16 = vld [vmem:[%s4804_s2 + $0x38] sm:$0xff] }
  0x75   : > { %s4905_s13 = smov (!%p539_p0, %s2770_s13), 7  ;;  %s4003_s28 = scalar_lea.vmem [#allocation10], %s2768_s19 }
  0x76   : > { %s2911_s29 = sshll.u32 %s4905_s13, 5  ;;  %s4005_s23 = scalar_lea.vmem [#allocation11], %s2769_s25 }
  0x77   : > { %s3926_s21 = scalar_lea.vmem %s4802_s0, %s2911_s29  ;;  %s550_s10 = scalar_lea.vmem %s4803_s1, %s2911_s29 }
  0x78   : > { %v3931_v1 = vld [vmem:[%s550_s10] sm:$0xff]  ;;  %v3933_v2 = vld [vmem:[%s550_s10 + $0x8] sm:$0xff]  ;;  %v3935_v3 = vld [vmem:[%s550_s10 + $0x10] sm:$0xff]  ;;  %s553_s30 = scalar_select %p552_p2, %s3657_s26, 1 }
  0x79   : > { %4863 = vst [vmem:[#allocation27_spill] sm:$0xff] %v3933_v2  ;;  %4864 = vst [vmem:[#allocation28_spill] sm:$0xff] %v3935_v3  ;;  %v3938_v4 = vld [vmem:[%s550_s10 + $0x18] sm:$0xff]  ;;  %v3940_v5 = vld [vmem:[%s550_s10 + $0x20] sm:$0xff]  ;;  %p2779_p10 = scmp.ne.s32.totalorder %s3657_s26, 0 }
  0x7a   : > { %4865 = vst [vmem:[#allocation29_spill] sm:$0xff] %v3938_v4  ;;  %4866 = vst [vmem:[#allocation30_spill] sm:$0xff] %v3940_v5  ;;  %v3942_v6 = vld [vmem:[%s550_s10 + $0x28] sm:$0xff]  ;;  %v3944_v7 = vld [vmem:[%s550_s10 + $0x30] sm:$0xff]  ;;  %s3186_s14 = smul.u32 192, %s553_s30  ;;  %s2778_s12 = sshll.u32 %s553_s30, 2 }
  0x7b   : > { %4867 = vst [vmem:[#allocation31_spill] sm:$0xff] %v3942_v6  ;;  %4868 = vst [vmem:[#allocation32_spill] sm:$0xff] %v3944_v7  ;;  %v3946_v8 = vld [vmem:[%s550_s10 + $0x38] sm:$0xff]  ;;  %s3971_s10 = scalar_lea.vmem %s4810_s8, %s2778_s12  ;;  %588 = sbr.rel (%p2779_p10) target bundleno = 356 (0x164), region = 80  ;;  %v3309_v17 = vld [vmem:[#allocation7] sm:$0xff] (!%p2779_p10)   ;;  %vm633_vm0 = vcmask (!%p2779_p10), 1041408  }
  0x7c   : > { %4869 = vst [vmem:[#allocation33_spill] sm:$0xff] %v3946_v8  ;;  %s3991_s12 = scalar_lea.vmem %s4808_s6, %s3186_s14  ;;  %s3996_s22 = scalar_lea.vmem %s4809_s7, %s3186_s14  ;;  %v3310_v18 = vld [vmem:[#allocation7 + $0x8] ss:$0 sps:$4 sm:$0x77] (!%p2779_p10)   ;;  %vm634_vm1 = vcmask (!%p2779_p10), 1042432   ;;  %2994 = vmatprep.subr.bf16.mxu0 (!%p2779_p10), %v3309_v17  ;;  %3150 = vmatprep.subr.bf16.mxu1 (!%p2779_p10), %v3309_v17  ;;  %v589_v19 = vld [vmem:[%s3926_s21] sm:$0xff] (!%p2779_p10) }
  0x7d   : > { %v590_v20 = vld [vmem:[%s3926_s21 + $0x8] sm:$0xff] (!%p2779_p10)  ;;  %vm620_vm2 = vcmask (!%p2779_p10), 171008   ;;  %v593_v21 = vld [vmem:[%s3926_s21 + $0x20] sm:$0xff] (!%p2779_p10)  ;;  %2995 = vmatpush3.bf16.msra.mxu0 (!%p2779_p10), %v3309_v17  ;;  %3152 = vmatpush3.bf16.msra.mxu1 (!%p2779_p10), %v3309_v17  ;;  %v3682_v22 = vmov (!%p2779_p10), 65535   ;;  %v591_v26 = vld [vmem:[%s3926_s21 + $0x10] sm:$0xff] (!%p2779_p10)  ;;  %v3683_v32 = vmov (!%p2779_p10), 0  }
  0x7e   : > { %v635_v23 = vsel (!%p2779_p10), %vm633_vm0, 4294967295, %v3682_v22  ;;  %v597_v24 = vpack.c.bf16 (!%p2779_p10), %v590_v20, %v589_v19  ;;  %v594_v25 = vld [vmem:[%s3926_s21 + $0x28] sm:$0xff] (!%p2779_p10)  ;;  %v592_v29 = vld [vmem:[%s3926_s21 + $0x18] sm:$0xff] (!%p2779_p10)  ;;  %v595_v30 = vld [vmem:[%s3926_s21 + $0x30] sm:$0xff] (!%p2779_p10)  ;;  %3308 = vset.pattern.permute.xlu1 (!%p2779_p10), %v3683_v32  ;;  %3307 = vset.pattern.permute.xlu0 (!%p2779_p10), %v3683_v32 }
  0x7f   : > { %v636_v27 = vsel (!%p2779_p10), %vm634_vm1, %v635_v23, 0  ;;  %v599_v28 = vpack.c.bf16 (!%p2779_p10), %v594_v25, %v593_v21  ;;  %v596_v31 = vld [vmem:[%s3926_s21 + $0x38] sm:$0xff] (!%p2779_p10)  ;;  %729 = vperm.xlu1 (!%p2779_p10), %3308, %v3935_v3   ;;  %719 = vperm.xlu0 (!%p2779_p10), %3307, %v3931_v1   ;;  %v598_v34 = vpack.c.bf16 (!%p2779_p10), %v592_v29, %v591_v26  ;;  %v2780_v41 = vld [vmem:[#allocation9] ss:$0 sm:$0xff] (!%p2779_p10)  ;;  %v705_v49 = vld [vmem:[#allocation4] sm:$0xff] (!%p2779_p10) }
  0x80   : > { %v638_v33 = vand.u32 (!%p2779_p10), %v3310_v18, %v636_v27  ;;  %2998 = vmatprep.mubr.msk.bf16.mxu0 (!%p2779_p10), %vm620_vm2, %v597_v24  ;;  %v600_v35 = vpack.c.bf16 (!%p2779_p10), %v596_v31, %v595_v30  ;;  %v707_v44 = vld [vmem:[#allocation4 + $0x10] sm:$0xff] (!%p2779_p10)  ;;  %v708_v54 = vld [vmem:[#allocation4 + $0x18] sm:$0xff] (!%p2779_p10)  ;;  %v706_v61 = vld [vmem:[#allocation4 + $0x8] sm:$0xff] (!%p2779_p10) }
  0x81   : > { %3002 = vmatprep.mubr.msk.bf16.mxu1 (!%p2779_p10), %vm620_vm2, %v599_v28 }
  0x82   : > { %2996 = vmatprep.subr.bf16.mxu0 %v638_v33  ;;  %3151 = vmatprep.subr.bf16.mxu1 %v638_v33 }
  0x83   : > { %2997 = vmatpush3.bf16.msra.mxu0 %v638_v33  ;;  %3153 = vmatpush3.bf16.msra.mxu1 %v638_v33 }
  0x84   : > { %734 = vperm.xlu1 %3308, %v3938_v4   ;;  %724 = vperm.xlu0 %3307, %v3933_v2  }
  0x86   : > { %2999 = vmatmul.mubr.msk.bf16.vlgmr.msra.gmra.mrb[0].mxu0 %vm620_vm2, %v598_v34  ;;  %3003 = vmatmul.mubr.msk.bf16.vlgmr.msra.gmra.mrb[0].mxu1 %vm620_vm2, %v600_v35 }
  0x88   : > { %744 = vperm.xlu1 %3308, %v3942_v6   ;;  %739 = vperm.xlu0 %3307, %v3940_v5  }
  0x8c   : > { %754 = vperm.xlu1 %3308, %v3946_v8   ;;  %749 = vperm.xlu0 %3307, %v3944_v7  }
  0xfe   : > { %v720_v36 = vpop.permute.xlu0 %719  ;;  %v730_v37 = vpop.permute.xlu1 %729 }
 0x103   : > { %v725_v38 = vpop.permute.xlu0 %724  ;;  %v735_v39 = vpop.permute.xlu1 %734 }
 0x107   : > { %v740_v40 = vpop.permute.xlu0 %739  ;;  %v745_v42 = vpop.permute.xlu1 %744 }
 0x10b   : > { %v750_v63 = vpop.permute.xlu0 %749  ;;  %v755_v24 = vpop.permute.xlu1 %754 }
 0x159   : > { %v3000_v43 = vpop.f32.mrb[0].mxu0  ;;  %v3004_v45 = vpop.f32.mrb[0].mxu1 }
 0x15a   : > { %v683_v46 = vadd.f32 %v3000_v43, %v2780_v41  ;;  %v699_v47 = vadd.f32 %v3004_v45, %v2780_v41  ;;  %v674_v48 = vpop.f32.mrb[1].mxu0  ;;  %v690_v50 = vpop.f32.mrb[1].mxu1 }
 0x15b   : > { %v675_v51 = vadd.f32 %v2780_v41, %v674_v48  ;;  %v691_v52 = vadd.f32 %v2780_v41, %v690_v50  ;;  %v3001_v53 = vpop.f32.mrb[2].mxu0  ;;  %v3005_v55 = vpop.f32.mrb[2].mxu1 }
 0x15c   : > { %v711_v56 = vadd.f32 %v707_v44, %v683_v46  ;;  %v715_v57 = vadd.f32 %v707_v44, %v699_v47  ;;  %v686_v58 = vadd.f32 %v3001_v53, %v2780_v41  ;;  %v702_v59 = vadd.f32 %v3005_v55, %v2780_v41  ;;  %v677_v60 = vpop.f32.mrb[3].mxu0  ;;  %v693_v62 = vpop.f32.mrb[3].mxu1 }
 0x15d   : > { %v709_v0 = vadd.f32 %v705_v49, %v675_v51  ;;  %v713_v17 = vadd.f32 %v705_v49, %v691_v52  ;;  %v678_v18 = vadd.f32 %v2780_v41, %v677_v60  ;;  %v694_v19 = vadd.f32 %v2780_v41, %v693_v62 }
 0x15e   : > { %v759_v20 = vmul.f32 %v730_v37, %v711_v56  ;;  %v763_v21 = vmul.f32 %v750_v63, %v715_v57  ;;  %v712_v22 = vadd.f32 %v708_v54, %v686_v58  ;;  %v716_v23 = vadd.f32 %v708_v54, %v702_v59 }
 0x15f   : > { %v757_v25 = vmul.f32 %v720_v36, %v709_v0  ;;  %v761_v26 = vmul.f32 %v740_v40, %v713_v17  ;;  %v710_v27 = vadd.f32 %v706_v61, %v678_v18  ;;  %v714_v28 = vadd.f32 %v706_v61, %v694_v19 }
 0x160   : > { %767 = vst [vmem:[#allocation2 + $0x10] sm:$0xff] %v759_v20  ;;  %771 = vst [vmem:[#allocation2 + $0x30] sm:$0xff] %v763_v21  ;;  %v760_v29 = vmul.f32 %v735_v39, %v712_v22  ;;  %v764_v30 = vmul.f32 %v755_v24, %v716_v23 }
 0x161   : > { %765 = vst [vmem:[#allocation2] sm:$0xff] %v757_v25  ;;  %769 = vst [vmem:[#allocation2 + $0x20] sm:$0xff] %v761_v26  ;;  %v758_v31 = vmul.f32 %v725_v38, %v710_v27  ;;  %v762_v32 = vmul.f32 %v745_v42, %v714_v28 }
 0x162   : > { %768 = vst [vmem:[#allocation2 + $0x18] sm:$0xff] %v760_v29  ;;  %772 = vst [vmem:[#allocation2 + $0x38] sm:$0xff] %v764_v30 }
 0x163   : > { %766 = vst [vmem:[#allocation2 + $0x8] sm:$0xff] %v758_v31  ;;  %770 = vst [vmem:[#allocation2 + $0x28] sm:$0xff] %v762_v32 }
 0x164 PF: > { %v3684_v33 = vmov 0   ;;  %v3315_v34 = vld [vmem:[%s3991_s12 + $0x40] sm:$0xff]   ;;  %v3316_v35 = vld [vmem:[%s3991_s12 + $0x48] sm:$0xff]   ;;  %v3317_v36 = vld [vmem:[%s3991_s12 + $0x50] sm:$0xff]   ;;  %v3685_v43 = vmov 1   ;;  %p2899_p13 = scmp.ne.s32.totalorder %s3657_s26, 1 }
 0x165   : > { %3312 = vset.pattern.permute.xlu1 %v3684_v33  ;;  %3311 = vset.pattern.permute.xlu0 %v3684_v33  ;;  %v3318_v37 = vld [vmem:[%s3991_s12 + $0x58] sm:$0xff]   ;;  %v3319_v38 = vld [vmem:[%s3991_s12 + $0x60] sm:$0xff]   ;;  %v3320_v39 = vld [vmem:[%s3991_s12 + $0x68] sm:$0xff]   ;;  %vm2230_vm5 = vcmp.gt.f32.partialorder (!%p2899_p13), %v3931_v1, 0.0  ;;  %vm2289_vm13 = vcmask (!%p2899_p13), 130112   ;;  %vm2296_vm14 = vcmask (!%p2899_p13), 195712  }
 0x166   : > { %794 = vperm.xlu1 %3312, %v3935_v3   ;;  %784 = vperm.xlu0 %3311, %v3931_v1   ;;  %v3321_v40 = vld [vmem:[%s3991_s12 + $0x70] sm:$0xff]   ;;  %v3322_v41 = vld [vmem:[%s3991_s12 + $0x78] sm:$0xff]   ;;  %v3323_v42 = vld [vmem:[%s3991_s12] sm:$0xff]   ;;  %vm2303_vm15 = vcmask (!%p2899_p13), 261312   ;;  %vm2324_vm0 = vcmask (!%p2899_p13), 1041409   ;;  %vm2327_vm1 = vcmask (!%p2899_p13), 254976  }
 0x167   : > { %3006 = vmatprep.subr.bf16.mxu0 %v3315_v34  ;;  %v776_v47 = vld [vmem:[#allocation2 + $0x10] sm:$0xff]  ;;  %v3324_v57 = vld [vmem:[%s3991_s12 + $0x8] sm:$0xff]   ;;  %v3326_v28 = vld [vmem:[%s3991_s12 + $0x18] sm:$0xff]  }
 0x168   : > { %3007 = vmatpush3.bf16.msra.mxu0 %v3315_v34  ;;  %v778_v50 = vld [vmem:[#allocation2 + $0x20] sm:$0xff]  ;;  %v780_v60 = vld [vmem:[#allocation2 + $0x30] sm:$0xff]  ;;  %v3328_v34 = vld [vmem:[%s3991_s12 + $0x28] sm:$0xff]  }
 0x169   : > { %3008 = vmatprep.subr.bf16.mxu0 %v3316_v35  ;;  %v777_v46 = vld [vmem:[#allocation2 + $0x18] sm:$0xff]  ;;  %v3325_v19 = vld [vmem:[%s3991_s12 + $0x10] sm:$0xff]   ;;  %v3327_v31 = vld [vmem:[%s3991_s12 + $0x20] sm:$0xff]  }
 0x16a   : > { %799 = vperm.xlu1 %3312, %v3938_v4   ;;  %789 = vperm.xlu0 %3311, %v3933_v2   ;;  %v779_v49 = vld [vmem:[#allocation2 + $0x28] sm:$0xff]  ;;  %v781_v59 = vld [vmem:[#allocation2 + $0x38] sm:$0xff] }
 0x16c   : > { %3009 = vmatpush3.bf16.msra.mxu0 %v3316_v35  ;;  %v3329_v35 = vld [vmem:[%s3991_s12 + $0x30] sm:$0xff]  }
 0x16d   : > { %3010 = vmatprep.subr.bf16.mxu0 %v3317_v36 }
 0x16e   : > { %809 = vperm.xlu1 %3312, %v3942_v6   ;;  %804 = vperm.xlu0 %3311, %v3940_v5  }
 0x170   : > { %3011 = vmatpush3.bf16.msra.mxu0 %v3317_v36 }
 0x171   : > { %3012 = vmatprep.subr.bf16.mxu0 %v3318_v37 }
 0x172   : > { %819 = vperm.xlu1 %3312, %v3946_v8   ;;  %814 = vperm.xlu0 %3311, %v3944_v7  }
 0x174   : > { %3013 = vmatpush3.bf16.msra.mxu0 %v3318_v37 }
 0x175   : > { %3014 = vmatprep.subr.bf16.mxu0 %v3319_v38 }
 0x176   : > { %860 = vperm.xlu1 %3312, %v3956_v10   ;;  %855 = vperm.xlu0 %3311, %v3951_v9  }
 0x178   : > { %3015 = vmatpush3.bf16.msra.mxu0 %v3319_v38 }
 0x179   : > { %3016 = vmatprep.subr.bf16.mxu0 %v3320_v39 }
 0x17a   : > { %870 = vperm.xlu1 %3312, %v3966_v12   ;;  %865 = vperm.xlu0 %3311, %v3961_v11  }
 0x17c   : > { %3017 = vmatpush3.bf16.msra.mxu0 %v3320_v39 }
 0x17d   : > { %3018 = vmatprep.subr.bf16.mxu0 %v3321_v40 }
 0x17e   : > { %880 = vperm.xlu1 %3312, %v3981_v14   ;;  %875 = vperm.xlu0 %3311, %v3976_v13  }
 0x180   : > { %3019 = vmatpush3.bf16.msra.mxu0 %v3321_v40 }
 0x181   : > { %3020 = vmatprep.subr.bf16.mxu0 %v3322_v41 }
 0x182   : > { %890 = vperm.xlu1 %3312, %v4001_v16   ;;  %885 = vperm.xlu0 %3311, %v3986_v15  }
 0x184   : > { %3021 = vmatpush3.bf16.msra.mxu0 %v3322_v41  ;;  %v3330_v41 = vld [vmem:[%s3991_s12 + $0x38] sm:$0xff]  }
 0x185   : > { %3030 = vmatprep.subr.bf16.mxu0 %v3323_v42 }
 0x186   : > { %3314 = vset.pattern.permute.xlu1 %v3685_v43  ;;  %3313 = vset.pattern.permute.xlu0 %v3685_v43 }
 0x187   : > { %927 = vperm.xlu1 %3314, %v3956_v10   ;;  %923 = vperm.xlu0 %3313, %v3951_v9   ;;  %v775_v10 = vld [vmem:[#allocation2 + $0x8] sm:$0xff]  ;;  %v774_v9 = vld [vmem:[#allocation2] sm:$0xff] }
 0x18b   : > { %931 = vperm.xlu1 %3314, %v3961_v11   ;;  %935 = vperm.xlu0 %3313, %v3966_v12  }
 0x18f   : > { %939 = vperm.xlu1 %3314, %v3976_v13   ;;  %943 = vperm.xlu0 %3313, %v3981_v14  }
 0x193   : > { %947 = vperm.xlu1 %3314, %v3986_v15   ;;  %951 = vperm.xlu0 %3313, %v4001_v16   ;;  %v4831_v15 = vlaneseq }
 0x195   : > { %v4097_v58 = vshrl.u32 %v4831_v15, 7 }
 0x197   : > { %vm844_vm3 = vcmp.lt.s32.totalorder %v4097_v58, 1  ;;  %vm913_vm4 = vcmp.lt.s32.totalorder %v4097_v58, 7 }
 0x1e5   : > { %v4061_v44 = vpop.permute.xlu1 %794  ;;  %v4063_v45 = vpop.permute.xlu0 %784 }
 0x1e6   : > { %v4076_v16 = vmul.f32 %v4061_v44, %v776_v47  ;;  %v4079_v48 = vmul.f32 %v4063_v45, %v774_v9 }
 0x1e8   : > { %v834_v20 = vrot.slane %v4079_v48, 7 }
 0x1e9   : > { %v4065_v11 = vpop.permute.xlu1 %799  ;;  %v4067_v12 = vpop.permute.xlu0 %789 }
 0x1ea   : > { %v4070_v13 = vmul.f32 %v4065_v11, %v777_v46  ;;  %v4073_v14 = vmul.f32 %v4067_v12, %v775_v10 }
 0x1ec   : > { %v830_v53 = vpack.c.bf16 %v4073_v14, %v4079_v48  ;;  %v831_v54 = vpack.c.bf16 %v4070_v13, %v4076_v16  ;;  %v835_v61 = vrot.slane %v4073_v14, 7  ;;  %v837_v38 = vrot.slane %v4070_v13, 7 }
 0x1ed   : > { %v4081_v51 = vpop.permute.xlu1 %809  ;;  %v4083_v52 = vpop.permute.xlu0 %804 }
 0x1ee   : > { %v4090_v55 = vmul.f32 %v4081_v51, %v779_v49  ;;  %v4093_v56 = vmul.f32 %v4083_v52, %v778_v50  ;;  %3022 = vmatprep.mubr.bf16.mxu0 %v830_v53  ;;  %v851_v23 = vsel %vm844_vm3, %v834_v20, %v835_v61 }
 0x1ef   : > { %3023 = vmatmul.mubr.bf16.vlgmr.msra.gmra.mrb[0].mxu0 %v831_v54  ;;  %v3331_v54 = vld [vmem:[%s3991_s12 + $0x80] sm:$0xff]  }
 0x1f0   : > { %3031 = vmatpush3.bf16.msra.mxu0 %v3323_v42  ;;  %v832_v0 = vpack.c.bf16 %v4090_v55, %v4093_v56  ;;  %v839_v39 = vrot.slane %v4090_v55, 7  ;;  %v838_v40 = vrot.slane %v4093_v56, 7  ;;  %v836_v42 = vrot.slane %v4076_v16, 7 }
 0x1f1   : > { %v4100_v62 = vpop.permute.xlu1 %819  ;;  %v4102_v63 = vpop.permute.xlu0 %814  ;;  %3032 = vmatprep.subr.bf16.mxu0 %v3324_v57 }
 0x1f2   : > { %v4107_v17 = vmul.f32 %v4100_v62, %v781_v59  ;;  %v4110_v18 = vmul.f32 %v4102_v63, %v780_v60  ;;  %3026 = vmatprep.mubr.bf16.mxu0 %v832_v0  ;;  %v849_v43 = vsel %vm844_vm3, %v836_v42, %v837_v38  ;;  %v850_v46 = vsel %vm844_vm3, %v835_v61, %v836_v42 }
 0x1f3   : > { %v847_v9 = vsel %vm844_vm3, %v838_v40, %v839_v39  ;;  %v848_v49 = vsel %vm844_vm3, %v837_v38, %v838_v40  ;;  %v906_v61 = vrot.slane %v4073_v14, 1  ;;  %v3334_v38 = vld [vmem:[%s3991_s12 + $0x98] sm:$0xff]   ;;  %v3335_v40 = vld [vmem:[%s3991_s12 + $0xa0] sm:$0xff]  }
 0x1f4   : > { %v841_v21 = vrot.slane %v4107_v17, 7  ;;  %3033 = vmatpush3.bf16.msra.mxu0 %v3324_v57  ;;  %v833_v25 = vpack.c.bf16 %v4107_v17, %v4110_v18  ;;  %v840_v60 = vrot.slane %v4110_v18, 7 }
 0x1f5   : > { %v4116_v22 = vpop.permute.xlu1 %860  ;;  %v4120_v24 = vpop.permute.xlu0 %855  ;;  %3034 = vmatprep.subr.bf16.mxu0 %v3325_v19 }
 0x1f6   : > { %v894_v26 = vmul.f32 %v4116_v22, %v851_v23  ;;  %v852_v27 = vsel %vm844_vm3, %v841_v21, %v834_v20  ;;  %v907_v23 = vrot.slane %v4076_v16, 1  ;;  %v845_v14 = vsel %vm844_vm3, %v840_v60, %v841_v21 }
 0x1f7   : > { %v893_v29 = vmul.f32 %v4120_v24, %v852_v27  ;;  %3027 = vmatmul.mubr.bf16.gmra.mrb[4].mxu0 %v833_v25  ;;  %v905_v25 = vrot.slane %v4079_v48, 1 }
 0x1f8   : > { %3035 = vmatpush3.bf16.msra.mxu0 %v3325_v19  ;;  %v3332_v19 = vld [vmem:[%s3991_s12 + $0x88] sm:$0xff]   ;;  %v919_v48 = vsel %vm913_vm4, %v906_v61, %v907_v23 }
 0x1f9   : > { %v901_v30 = vpack.c.bf16 %v894_v26, %v893_v29  ;;  %3036 = vmatprep.subr.bf16.mxu0 %v3326_v28  ;;  %v4130_v32 = vpop.permute.xlu1 %870  ;;  %v4132_v33 = vpop.permute.xlu0 %865 }
 0x1fa   : > { %v896_v10 = vmul.f32 %v4130_v32, %v849_v43  ;;  %v895_v47 = vmul.f32 %v4132_v33, %v850_v46  ;;  %v3337_v46 = vld [vmem:[%s3991_s12 + $0xb0] sm:$0xff]  }
 0x1fb   : > { %3046 = vmatprep.mubr.bf16.mxu0 %v901_v30  ;;  %v920_v30 = vsel %vm913_vm4, %v905_v25, %v906_v61 }
 0x1fc   : > { %3037 = vmatpush3.bf16.msra.mxu0 %v3326_v28  ;;  %v902_v0 = vpack.c.bf16 %v896_v10, %v895_v47  ;;  %v846_v28 = vsel %vm844_vm3, %v839_v39, %v840_v60  ;;  %v908_v10 = vrot.slane %v4070_v13, 1  ;;  %v909_v47 = vrot.slane %v4093_v56, 1 }
 0x1fd   : > { %3038 = vmatprep.subr.bf16.mxu0 %v3327_v31  ;;  %v4136_v36 = vpop.permute.xlu1 %880  ;;  %v4138_v37 = vpop.permute.xlu0 %875 }
 0x1fe   : > { %v898_v57 = vmul.f32 %v4136_v36, %v847_v9  ;;  %v897_v59 = vmul.f32 %v4138_v37, %v848_v49  ;;  %v910_v9 = vrot.slane %v4090_v55, 1  ;;  %v911_v49 = vrot.slane %v4110_v18, 1 }
 0x1ff   : > { %v918_v60 = vsel %vm913_vm4, %v907_v23, %v908_v10  ;;  %v917_v61 = vsel %vm913_vm4, %v908_v10, %v909_v47 }
 0x200   : > { %3039 = vmatpush3.bf16.msra.mxu0 %v3327_v31  ;;  %v903_v20 = vpack.c.bf16 %v898_v57, %v897_v59  ;;  %v3333_v31 = vld [vmem:[%s3991_s12 + $0x90] sm:$0xff]   ;;  %v916_v55 = vsel %vm913_vm4, %v909_v47, %v910_v9  ;;  %v915_v18 = vsel %vm913_vm4, %v910_v9, %v911_v49 }
 0x201   : > { %3040 = vmatprep.subr.bf16.mxu0 %v3328_v34  ;;  %v4155_v50 = vpop.permute.xlu1 %890  ;;  %v4157_v53 = vpop.permute.xlu0 %885 }
 0x202   : > { %v900_v29 = vmul.f32 %v4155_v50, %v845_v14  ;;  %v899_v16 = vmul.f32 %v4157_v53, %v846_v28 }
 0x204   : > { %3041 = vmatpush3.bf16.msra.mxu0 %v3328_v34 }
 0x205   : > { %3042 = vmatprep.subr.bf16.mxu0 %v3329_v35 }
 0x206   : > { %v4168_v26 = vpop.permute.xlu1 %927  ;;  %v4170_v27 = vpop.permute.xlu0 %923 }
 0x207   : > { %v955_v21 = vmul.f32 %v4168_v26, %v919_v48  ;;  %v954_v34 = vmul.f32 %v4170_v27, %v920_v30 }
 0x208   : > { %3043 = vmatpush3.bf16.msra.mxu0 %v3329_v35  ;;  %v904_v35 = vpack.c.bf16 %v900_v29, %v899_v16 }
 0x209   : > { %3044 = vmatprep.subr.bf16.mxu0 %v3330_v41  ;;  %v962_v39 = vpack.c.bf16 %v955_v21, %v954_v34 }
 0x20a   : > { %v4188_v42 = vpop.permute.xlu1 %931  ;;  %v4190_v43 = vpop.permute.xlu0 %935 }
 0x20b   : > { %v956_v13 = vmul.f32 %v4188_v42, %v918_v60  ;;  %v957_v56 = vmul.f32 %v4190_v43, %v917_v61 }
 0x20c   : > { %3045 = vmatpush3.bf16.msra.mxu0 %v3330_v41  ;;  %v3336_v41 = vld [vmem:[%s3991_s12 + $0xa8] sm:$0xff]  }
 0x20d   : > { %3054 = vmatprep.subr.bf16.mxu0 %v3331_v54  ;;  %v963_v23 = vpack.c.bf16 %v957_v56, %v956_v13  ;;  %v3339_v13 = vld [vmem:[%s3996_s22 + $0x40] sm:$0xff]   ;;  %v3340_v56 = vld [vmem:[%s3996_s22 + $0x48] sm:$0xff]  }
 0x20e   : > { %v4198_v57 = vpop.permute.xlu1 %939  ;;  %v4200_v59 = vpop.permute.xlu0 %943  ;;  %3078 = vmatprep.subr.bf16.mxu1 %v3339_v13 }
 0x20f   : > { %3047 = vmatmul.mubr.bf16.vlgmr.msra.gmra.mrb[0].mxu0 %v902_v0  ;;  %v958_v0 = vmul.f32 %v4198_v57, %v916_v55  ;;  %3079 = vmatpush3.bf16.msra.mxu1 %v3339_v13  ;;  %v3341_v55 = vld [vmem:[%s3996_s22 + $0x50] sm:$0xff]  }
 0x210   : > { %3050 = vmatprep.mubr.bf16.mxu0 %v903_v20  ;;  %3055 = vmatpush3.bf16.msra.mxu0 %v3331_v54  ;;  %v3338_v54 = vld [vmem:[%s3991_s12 + $0xb8] sm:$0xff]   ;;  %v912_v20 = vrot.slane %v4107_v17, 1 }
 0x211   : > { %3056 = vmatprep.subr.bf16.mxu0 %v3332_v19  ;;  %3080 = vmatprep.subr.bf16.mxu1 %v3340_v56 }
 0x212   : > { %v4215_v28 = vpop.permute.xlu1 %947  ;;  %v4217_v29 = vpop.permute.xlu0 %951  ;;  %v914_v16 = vsel %vm913_vm4, %v911_v49, %v912_v20  ;;  %v921_v48 = vsel %vm913_vm4, %v912_v20, %v905_v25  ;;  %v3345_v20 = vld [vmem:[%s3996_s22 + $0x70] sm:$0xff]  }
 0x213   : > { %v960_v30 = vmul.f32 %v4215_v28, %v914_v16  ;;  %3081 = vmatpush3.bf16.msra.mxu1 %v3340_v56 }
 0x214   : > { %3057 = vmatpush3.bf16.msra.mxu0 %v3332_v19  ;;  %v959_v19 = vmul.f32 %v4200_v59, %v915_v18  ;;  %3082 = vmatprep.subr.bf16.mxu1 %v3341_v55  ;;  %v3342_v18 = vld [vmem:[%s3996_s22 + $0x58] sm:$0xff]  }
 0x215   : > { %3058 = vmatprep.subr.bf16.mxu0 %v3333_v31 }
 0x216   : > { %v964_v14 = vpack.c.bf16 %v959_v19, %v958_v0  ;;  %v3343_v0 = vld [vmem:[%s3996_s22 + $0x60] sm:$0xff]   ;;  %v3344_v19 = vld [vmem:[%s3996_s22 + $0x68] sm:$0xff]  }
 0x217   : > { %3051 = vmatmul.mubr.bf16.gmra.mrb[4].mxu0 %v904_v35  ;;  %3083 = vmatpush3.bf16.msra.mxu1 %v3341_v55 }
 0x218   : > { %3059 = vmatpush3.bf16.msra.mxu0 %v3333_v31  ;;  %3070 = vmatprep.mubr.bf16.mxu0 %v962_v39  ;;  %v961_v31 = vmul.f32 %v4217_v29, %v921_v48 }
 0x219   : > { %3060 = vmatprep.subr.bf16.mxu0 %v3334_v38  ;;  %3084 = vmatprep.subr.bf16.mxu1 %v3342_v18 }
 0x21a   : > { %v965_v17 = vpack.c.bf16 %v961_v31, %v960_v30 }
 0x21b   : > { %3085 = vmatpush3.bf16.msra.mxu1 %v3342_v18 }
 0x21c   : > { %3061 = vmatpush3.bf16.msra.mxu0 %v3334_v38  ;;  %3086 = vmatprep.subr.bf16.mxu1 %v3343_v0 }
 0x21d   : > { %3062 = vmatprep.subr.bf16.mxu0 %v3335_v40 }
 0x21f   : > { %3087 = vmatpush3.bf16.msra.mxu1 %v3343_v0 }
 0x220   : > { %3063 = vmatpush3.bf16.msra.mxu0 %v3335_v40  ;;  %3088 = vmatprep.subr.bf16.mxu1 %v3344_v19 }
 0x221   : > { %3064 = vmatprep.subr.bf16.mxu0 %v3336_v41 }
 0x223   : > { %3089 = vmatpush3.bf16.msra.mxu1 %v3344_v19 }
 0x224   : > { %3065 = vmatpush3.bf16.msra.mxu0 %v3336_v41  ;;  %3090 = vmatprep.subr.bf16.mxu1 %v3345_v20 }
 0x225   : > { %3066 = vmatprep.subr.bf16.mxu0 %v3337_v46 }
 0x227   : > { %3091 = vmatpush3.bf16.msra.mxu1 %v3345_v20 }
 0x228   : > { %3067 = vmatpush3.bf16.msra.mxu0 %v3337_v46 }
 0x229   : > { %3068 = vmatprep.subr.bf16.mxu0 %v3338_v54 }
 0x22c   : > { %3069 = vmatpush3.bf16.msra.mxu0 %v3338_v54 }
 0x22f   : > { %3071 = vmatmul.mubr.bf16.vlgmr.msra.gmra.mrb[0].mxu0 %v963_v23  ;;  %v3346_v23 = vld [vmem:[%s3996_s22 + $0x78] sm:$0xff]  }
 0x230   : > { %3074 = vmatprep.mubr.bf16.mxu0 %v964_v14  ;;  %3092 = vmatprep.subr.bf16.mxu1 %v3346_v23  ;;  %v4274_v14 = vld [vmem:[%s3996_s22] sm:$0xff]  }
 0x231   : > { %3093 = vmatpush3.bf16.msra.mxu1 %v3346_v23 }
 0x232   : > { %3102 = vmatprep.subr.bf16.mxu1 %v4274_v14 }
 0x237   : > { %3075 = vmatmul.mubr.bf16.gmra.mrb[4].mxu0 %v965_v17 }
 0x302   : > { %v4225_v21 = vpop.f32.mrb[0].mxu0 }
 0x303   : > { %1367 = vadd.xlane.f32.xlu0 %v4225_v21  ;;  %v4228_v34 = vpop.f32.mrb[1].mxu0  ;;  %v1389_v47 = vmul.f32 %v4225_v21, %v4225_v21 }
 0x304   : > { %1363 = vadd.xlane.f32.xlu1 %v4228_v34  ;;  %v4231_v35 = vpop.f32.mrb[2].mxu0  ;;  %v1387_v25 = vmul.f32 %v4228_v34, %v4228_v34 }
 0x305   : > { %v4233_v38 = vpop.f32.mrb[3].mxu0  ;;  %v1390_v9 = vmul.f32 %v4231_v35, %v4231_v35 }
 0x306   : > { %v1388_v40 = vmul.f32 %v4233_v38, %v4233_v38 }
 0x307   : > { %1365 = vadd.xlane.f32.xlu0 %v4233_v38 }
 0x308   : > { %1369 = vadd.xlane.f32.xlu1 %v4231_v35 }
 0x30a   : > { %v4239_v39 = vpop.f32.mrb[4].mxu0 }
 0x30b   : > { %1395 = vadd.xlane.f32.xlu0 %v1387_v25  ;;  %v4243_v41 = vpop.f32.mrb[5].mxu0  ;;  %v1393_v60 = vmul.f32 %v4239_v39, %v4239_v39 }
 0x30c   : > { %1397 = vadd.xlane.f32.xlu1 %v1388_v40  ;;  %v4245_v46 = vpop.f32.mrb[6].mxu0  ;;  %v1391_v49 = vmul.f32 %v4243_v41, %v4243_v41 }
 0x30d   : > { %v4247_v10 = vpop.f32.mrb[7].mxu0  ;;  %v1394_v61 = vmul.f32 %v4245_v46, %v4245_v46 }
 0x30e   : > { %v1392_v54 = vmul.f32 %v4247_v10, %v4247_v10 }
 0x30f   : > { %1399 = vadd.xlane.f32.xlu0 %v1389_v47 }
 0x310   : > { %1401 = vadd.xlane.f32.xlu1 %v1390_v9 }
 0x313   : > { %1375 = vadd.xlane.f32.xlu0 %v4239_v39 }
 0x314   : > { %1377 = vadd.xlane.f32.xlu1 %v4245_v46 }
 0x317   : > { %1371 = vadd.xlane.f32.xlu0 %v4243_v41 }
 0x318   : > { %1373 = vadd.xlane.f32.xlu1 %v4247_v10 }
 0x31b   : > { %1403 = vadd.xlane.f32.xlu0 %v1391_v49 }
 0x31c   : > { %1405 = vadd.xlane.f32.xlu1 %v1392_v54 }
 0x31f   : > { %1407 = vadd.xlane.f32.xlu0 %v1393_v60 }
 0x320   : > { %1409 = vadd.xlane.f32.xlu1 %v1394_v61 }
 0x390   : > { %v1368_v16 = vpop.xlane.xlu0 %1367 }
 0x391   : > { %v1364_v48 = vpop.xlane.xlu1 %1363  ;;  %v4277_v47 = vmul.f32 0.03125, %v1368_v16 }
 0x392   : > { %v1379_v31 = vmul.f32 0.03125, %v1364_v48 }
 0x393   : > { %v1421_v0 = vmul.f32 %v4277_v47, %v4277_v47 }
 0x394   : > { %v1366_v30 = vpop.xlane.xlu0 %1365  ;;  %v1419_v9 = vmul.f32 %v1379_v31, %v1379_v31 }
 0x395   : > { %v1370_v17 = vpop.xlane.xlu1 %1369  ;;  %v1380_v25 = vmul.f32 0.03125, %v1366_v30 }
 0x396   : > { %v4279_v61 = vmul.f32 0.03125, %v1370_v17 }
 0x397   : > { %v1420_v60 = vmul.f32 %v1380_v25, %v1380_v25 }
 0x398   : > { %v1396_v40 = vpop.xlane.xlu0 %1395  ;;  %v1422_v16 = vmul.f32 %v4279_v61, %v4279_v61  ;;  %v1438_v8 = vsub.f32 %v4231_v35, %v4279_v61 }
 0x399   : > { %v1411_v49 = vmul.f32 0.03125, %v1396_v40  ;;  %v1398_v54 = vpop.xlane.xlu1 %1397 }
 0x39a   : > { %v1412_v13 = vmul.f32 0.03125, %v1398_v54 }
 0x39b   : > { %v1427_v56 = vsub.f32 %v1411_v49, %v1419_v9 }
 0x39c   : > { %v1428_v55 = vsub.f32 %v1412_v13, %v1420_v60  ;;  %v1400_v18 = vpop.xlane.xlu0 %1399 }
 0x39d   : > { %v1443_v19 = vadd.f32 1e-05, %v1427_v56  ;;  %v1413_v20 = vmul.f32 0.03125, %v1400_v18  ;;  %v1402_v23 = vpop.xlane.xlu1 %1401  ;;  %v4286_v56 = vsub.s32 0, %v4097_v58 }
 0x39e   : > { %v1444_v48 = vadd.f32 1e-05, %v1428_v55  ;;  %v1414_v30 = vmul.f32 0.03125, %v1402_v23  ;;  %v4291_v55 = vld [vmem:[%s3971_s10] sm:$0xf] }
 0x39f   : > { %3363 = vrsqrt.f32 %v1443_v19  ;;  %v1429_v40 = vsub.f32 %v1413_v20, %v1421_v0  ;;  %4870 = vst [vmem:[#allocation34_spill] sm:$0xff] %v4286_v56  ;;  %v4296_v0 = vsub.s32 1, %v4097_v58  ;;  %v1435_v19 = vsub.f32 %v4228_v34, %v1379_v31 }
 0x3a0   : > { %3365 = vrsqrt.f32 %v1444_v48  ;;  %v1430_v17 = vsub.f32 %v1414_v30, %v1422_v16  ;;  %v1376_v54 = vpop.xlane.xlu0 %1375  ;;  %v4303_v48 = vrot.slane %v4291_v55, %v4286_v56 }
 0x3a1   : > { %v1445_v9 = vadd.f32 1e-05, %v1429_v40  ;;  %v1378_v49 = vpop.xlane.xlu1 %1377  ;;  %4871 = vst [vmem:[#allocation35_spill] sm:$0xff] %v4296_v0  ;;  %v4299_v20 = vmul.f32 0.03125, %v1376_v54  ;;  %v1436_v40 = vsub.f32 %v4233_v38, %v1380_v25  ;;  %v4314_v56 = vrot.slane %v4291_v55, %v4296_v0 }
 0x3a2   : > { %v1446_v60 = vadd.f32 1e-05, %v1430_v17  ;;  %v4306_v17 = vmul.f32 0.03125, %v1378_v49  ;;  %v1437_v38 = vsub.f32 %v4225_v21, %v4277_v47 }
 0x3a3   : > { %3367 = vrsqrt.f32 %v1445_v9 }
 0x3a4   : > { %3369 = vrsqrt.f32 %v1446_v60  ;;  %v1372_v13 = vpop.xlane.xlu0 %1371 }
 0x3a5   : > { %v4288_v18 = vmul.f32 0.03125, %v1372_v13  ;;  %v1374_v15 = vpop.xlane.xlu1 %1373 }
 0x3a6   : > { %v4293_v23 = vmul.f32 0.03125, %v1374_v15 }
 0x3a7   : > { %v1423_v15 = vmul.f32 %v4288_v18, %v4288_v18 }
 0x3a8   : > { %v1404_v16 = vpop.xlane.xlu0 %1403  ;;  %v1424_v34 = vmul.f32 %v4293_v23, %v4293_v23 }
 0x3a9   : > { %v3364_v30 = vpop.eup %3363  ;;  %v1415_v9 = vmul.f32 0.03125, %v1404_v16  ;;  %v1406_v60 = vpop.xlane.xlu1 %1405  ;;  %v1425_v16 = vmul.f32 %v4299_v20, %v4299_v20 }
 0x3aa   : > { %v3366_v13 = vpop.eup %3365  ;;  %v1416_v31 = vmul.f32 0.03125, %v1406_v60  ;;  %v1459_v54 = vmul.f32 %v3364_v30, %v1435_v19  ;;  %v1426_v30 = vmul.f32 %v4306_v17, %v4306_v17 }
 0x3ab   : > { %v1431_v25 = vsub.f32 %v1415_v9, %v1423_v15  ;;  %v1460_v49 = vmul.f32 %v3366_v13, %v1436_v40 }
 0x3ac   : > { %v1432_v4 = vsub.f32 %v1416_v31, %v1424_v34  ;;  %v1408_v7 = vpop.xlane.xlu0 %1407  ;;  %v1471_v60 = vmul.f32 %v4303_v48, %v1459_v54 }
 0x3ad   : > { %v3368_v19 = vpop.eup %3367  ;;  %v1447_v0 = vadd.f32 1e-05, %v1431_v25  ;;  %v1417_v3 = vmul.f32 0.03125, %v1408_v7  ;;  %v1410_v6 = vpop.xlane.xlu1 %1409  ;;  %v1472_v21 = vmul.f32 %v4303_v48, %v1460_v49 }
 0x3ae   : > { %v3370_v47 = vpop.eup %3369  ;;  %v1461_v40 = vmul.f32 %v3368_v19, %v1437_v38  ;;  %v1448_v15 = vadd.f32 1e-05, %v1432_v4  ;;  %v1418_v35 = vmul.f32 0.03125, %v1410_v6  ;;  %v1483_v61 = vadd.f32 %v4314_v56, %v1471_v60 }
 0x3af   : > { %v1462_v9 = vmul.f32 %v3370_v47, %v1438_v8  ;;  %3371 = vrsqrt.f32 %v1447_v0  ;;  %v1433_v13 = vsub.f32 %v1417_v3, %v1425_v16  ;;  %v1484_v34 = vadd.f32 %v4314_v56, %v1472_v21 }
 0x3b0   : > { %3373 = vrsqrt.f32 %v1448_v15  ;;  %v1434_v31 = vsub.f32 %v1418_v35, %v1426_v30  ;;  %v1499_v54 = vmul.f32 0.70710677, %v1483_v61  ;;  %v1473_v7 = vmul.f32 %v4303_v48, %v1461_v40 }
 0x3b1   : > { %v1449_v5 = vadd.f32 1e-05, %v1433_v13  ;;  %v1500_v25 = vmul.f32 0.70710677, %v1484_v34  ;;  %v1474_v38 = vmul.f32 %v4303_v48, %v1462_v9  ;;  %v1439_v0 = vsub.f32 %v4243_v41, %v4288_v18 }
 0x3b2   : > { %v1450_v2 = vadd.f32 1e-05, %v1434_v31  ;;  %3375 = verf.f32 %v1499_v54  ;;  %v1485_v4 = vadd.f32 %v4314_v56, %v1473_v7  ;;  %v1440_v16 = vsub.f32 %v4247_v10, %v4293_v23 }
 0x3b3   : > { %3377 = vrsqrt.f32 %v1449_v5  ;;  %v1486_v6 = vadd.f32 %v4314_v56, %v1474_v38  ;;  %v1442_v40 = vsub.f32 %v4245_v46, %v4306_v17  ;;  %v1491_v15 = vmul.f32 0.5, %v1483_v61 }
 0x3b4   : > { %3379 = vrsqrt.f32 %v1450_v2  ;;  %v1501_v3 = vmul.f32 0.70710677, %v1485_v4  ;;  %v1441_v2 = vsub.f32 %v4239_v39, %v4299_v20  ;;  %v1492_v39 = vmul.f32 0.5, %v1484_v34 }
 0x3b5   : > { %3381 = verf.f32 %v1500_v25  ;;  %v1502_v8 = vmul.f32 0.70710677, %v1486_v6  ;;  %v1493_v17 = vmul.f32 0.5, %v1485_v4 }
 0x3b6   : > { %3383 = verf.f32 %v1501_v3 }
 0x3b7   : > { %3385 = verf.f32 %v1502_v8 }
 0x3b9   : > { %v3372_v49 = vpop.eup %3371 }
 0x3ba   : > { %v3374_v60 = vpop.eup %3373  ;;  %v1463_v19 = vmul.f32 %v3372_v49, %v1439_v0 }
 0x3bb   : > { %v1464_v5 = vmul.f32 %v3374_v60, %v1440_v16  ;;  %v1494_v60 = vmul.f32 0.5, %v1486_v6 }
 0x3bc   : > { %v3376_v30 = vpop.eup %3375  ;;  %v1475_v21 = vmul.f32 %v4303_v48, %v1463_v19 }
 0x3bd   : > { %v3378_v47 = vpop.eup %3377  ;;  %v1515_v41 = vadd.f32 1.0, %v3376_v30  ;;  %v1476_v18 = vmul.f32 %v4303_v48, %v1464_v5 }
 0x3be   : > { %v3380_v35 = vpop.eup %3379  ;;  %v1465_v9 = vmul.f32 %v3378_v47, %v1441_v2  ;;  %v1487_v10 = vadd.f32 %v4314_v56, %v1475_v21 }
 0x3bf   : > { %v3382_v23 = vpop.eup %3381  ;;  %v1466_v13 = vmul.f32 %v3380_v35, %v1442_v40  ;;  %v1523_v31 = vmul.f32 %v1515_v41, %v1491_v15  ;;  %v1488_v54 = vadd.f32 %v4314_v56, %v1476_v18 }
 0x3c0   : > { %v1516_v20 = vadd.f32 1.0, %v3382_v23  ;;  %v1503_v25 = vmul.f32 0.70710677, %v1487_v10  ;;  %v1477_v7 = vmul.f32 %v4303_v48, %v1465_v9  ;;  %v3384_v38 = vpop.eup %3383 }
 0x3c1   : > { %v4346_v46 = vmul.f32 %v1523_v31, %v4063_v45  ;;  %v1504_v61 = vmul.f32 0.70710677, %v1488_v54  ;;  %v1478_v3 = vmul.f32 %v4303_v48, %v1466_v13  ;;  %v3386_v8 = vpop.eup %3385  ;;  %v1517_v49 = vadd.f32 1.0, %v3384_v38 }
 0x3c2   : > { %v1524_v0 = vmul.f32 %v1516_v20, %v1492_v39  ;;  %3387 = verf.f32 %v1503_v25  ;;  %v1489_v16 = vadd.f32 %v4314_v56, %v1477_v7  ;;  %v1518_v19 = vadd.f32 1.0, %v3386_v8 }
 0x3c3   : > { %v1543_v34 = vrot.slane %v4346_v46, 7  ;;  %3389 = verf.f32 %v1504_v61  ;;  %v1571_v45 = vrot.slane %v4346_v46, 1  ;;  %v1525_v30 = vmul.f32 %v1517_v49, %v1493_v17 }
 0x3c4   : > { %v1532_v5 = vmul.f32 %v1524_v0, %v4067_v12  ;;  %v1490_v4 = vadd.f32 %v4314_v56, %v1478_v3  ;;  %v1526_v2 = vmul.f32 %v1518_v19, %v1494_v60  ;;  %v1505_v48 = vmul.f32 0.70710677, %v1489_v16  ;;  %v3349_v3 = vld [vmem:[%s3996_s22 + $0x10] sm:$0xff]  }
 0x3c5   : > { %v1533_v15 = vmul.f32 %v1525_v30, %v4061_v44  ;;  %v1495_v8 = vmul.f32 0.5, %v1487_v10 }
 0x3c6   : > { %v1539_v21 = vpack.c.bf16 %v1532_v5, %v4346_v46  ;;  %v1544_v47 = vrot.slane %v1532_v5, 7  ;;  %v1572_v40 = vrot.slane %v1532_v5, 1  ;;  %v1534_v6 = vmul.f32 %v1526_v2, %v4065_v11  ;;  %v3348_v11 = vld [vmem:[%s3996_s22 + $0x8] sm:$0xff]   ;;  %v3355_v46 = vld [vmem:[%s3996_s22 + $0x80] sm:$0xff]  }
 0x3c7   : > { %v1506_v41 = vmul.f32 0.70710677, %v1490_v4  ;;  %3391 = verf.f32 %v1505_v48  ;;  %v1545_v12 = vrot.slane %v1533_v15, 7  ;;  %v1573_v18 = vrot.slane %v1533_v15, 1 }
 0x3c8   : > { %3094 = vmatprep.mubr.bf16.mxu1 %v1539_v21  ;;  %v4361_v56 = vsel %vm844_vm3, %v1543_v34, %v1544_v47  ;;  %v1585_v35 = vsel %vm913_vm4, %v1571_v45, %v1572_v40  ;;  %v1540_v9 = vpack.c.bf16 %v1534_v6, %v1533_v15  ;;  %v1546_v44 = vrot.slane %v1534_v6, 7 }
 0x3c9   : > { %v1574_v23 = vrot.slane %v1534_v6, 1  ;;  %3393 = verf.f32 %v1506_v41  ;;  %v1556_v13 = vsel %vm844_vm3, %v1544_v47, %v1545_v12  ;;  %v1584_v31 = vsel %vm913_vm4, %v1572_v40, %v1573_v18 }
 0x3ca   : > { %v4373_v39 = vmul.f32 %v1585_v35, %v4170_v27  ;;  %3095 = vmatmul.mubr.bf16.vlgmr.msra.gmra.mrb[0].mxu1 %v1540_v9  ;;  %v1555_v20 = vsel %vm844_vm3, %v1545_v12, %v1546_v44  ;;  %v4378_v25 = vmul.f32 %v1556_v13, %v4132_v33  ;;  %v4381_v7 = vmul.f32 %v1584_v31, %v4168_v26 }
 0x3cb   : > { %v1583_v38 = vsel %vm913_vm4, %v1573_v18, %v1574_v23  ;;  %3103 = vmatpush3.bf16.msra.mxu1 %v4274_v14  ;;  %v4387_v27 = vmul.f32 %v1555_v20, %v4130_v32  ;;  %v1496_v26 = vmul.f32 0.5, %v1488_v54  ;;  %v3350_v32 = vld [vmem:[%s3996_s22 + $0x18] sm:$0xff]   ;;  %v1497_v2 = vmul.f32 0.5, %v1489_v16  ;;  %v3351_v18 = vld [vmem:[%s3996_s22 + $0x20] sm:$0xff]  }
 0x3cc   : > { %v3388_v17 = vpop.eup %3387  ;;  %3104 = vmatprep.subr.bf16.mxu1 %v3348_v11  ;;  %v1595_v33 = vpack.c.bf16 %v4381_v7, %v4373_v39  ;;  %v1498_v54 = vmul.f32 0.5, %v1490_v4  ;;  %v4408_v31 = vmul.f32 %v1583_v38, %v4188_v42 }
 0x3cd   : > { %v3390_v61 = vpop.eup %3389  ;;  %v1519_v0 = vadd.f32 1.0, %v3388_v17  ;;  %v1568_v60 = vpack.c.bf16 %v4387_v27, %v4378_v25  ;;  %v3360_v25 = vld [vmem:[%s3996_s22 + $0xa8] sm:$0xff]   ;;  %v3361_v27 = vld [vmem:[%s3996_s22 + $0xb0] sm:$0xff]  }
 0x3ce   : > { %v1520_v49 = vadd.f32 1.0, %v3390_v61 }
 0x3cf   : > { %v1527_v19 = vmul.f32 %v1519_v0, %v1495_v8  ;;  %3105 = vmatpush3.bf16.msra.mxu1 %v3348_v11 }
 0x3d0   : > { %v1528_v14 = vmul.f32 %v1520_v49, %v1496_v26  ;;  %3106 = vmatprep.subr.bf16.mxu1 %v3349_v3 }
 0x3d1   : > { %v3392_v5 = vpop.eup %3391  ;;  %v1535_v30 = vmul.f32 %v1527_v19, %v4083_v52  ;;  %v1560_v19 = vmul.f32 %v4361_v56, %v4116_v22 }
 0x3d2   : > { %v1536_v10 = vmul.f32 %v1528_v14, %v4081_v51  ;;  %v1521_v48 = vadd.f32 1.0, %v3392_v5 }
 0x3d3   : > { %v3394_v21 = vpop.eup %3393  ;;  %v1575_v47 = vrot.slane %v1535_v30, 1  ;;  %v1547_v40 = vrot.slane %v1535_v30, 7  ;;  %3107 = vmatpush3.bf16.msra.mxu1 %v3349_v3  ;;  %v3352_v3 = vld [vmem:[%s3996_s22 + $0x28] sm:$0xff]  }
 0x3d4   : > { %v1541_v15 = vpack.c.bf16 %v1536_v10, %v1535_v30  ;;  %v1522_v6 = vadd.f32 1.0, %v3394_v21  ;;  %v1529_v41 = vmul.f32 %v1521_v48, %v1497_v2  ;;  %v1548_v12 = vrot.slane %v1536_v10, 7  ;;  %3108 = vmatprep.subr.bf16.mxu1 %v3350_v32  ;;  %v3359_v2 = vld [vmem:[%s3996_s22 + $0xa0] sm:$0xff]  }
 0x3d5   : > { %v1554_v35 = vsel %vm844_vm3, %v1546_v44, %v1547_v40  ;;  %v1582_v52 = vsel %vm913_vm4, %v1574_v23, %v1575_v47  ;;  %v1576_v51 = vrot.slane %v1536_v10, 1  ;;  %v3354_v10 = vld [vmem:[%s3996_s22 + $0x38] sm:$0xff]  }
 0x3d6   : > { %3098 = vmatprep.mubr.bf16.mxu1 %v1541_v15  ;;  %v1530_v16 = vmul.f32 %v1522_v6, %v1498_v54  ;;  %v1537_v4 = vmul.f32 %v1529_v41, %v4102_v63  ;;  %v1553_v9 = vsel %vm844_vm3, %v1547_v40, %v1548_v12  ;;  %v1563_v11 = vmul.f32 %v1554_v35, %v4138_v37 }
 0x3d7   : > { %v1564_v13 = vmul.f32 %v1553_v9, %v4136_v36  ;;  %v4411_v44 = vmul.f32 %v1582_v52, %v4190_v43  ;;  %v1581_v23 = vsel %vm913_vm4, %v1575_v47, %v1576_v51  ;;  %3109 = vmatpush3.bf16.msra.mxu1 %v3350_v32  ;;  %v3353_v32 = vld [vmem:[%s3996_s22 + $0x30] sm:$0xff]  }
 0x3d8   : > { %v1538_v20 = vmul.f32 %v1530_v16, %v4100_v62  ;;  %v1549_v63 = vrot.slane %v1537_v4, 7  ;;  %v1577_v17 = vrot.slane %v1537_v4, 1  ;;  %3110 = vmatprep.subr.bf16.mxu1 %v3351_v18  ;;  %v1591_v62 = vmul.f32 %v1581_v23, %v4198_v57 }
 0x3d9   : > { %v1569_v61 = vpack.c.bf16 %v1564_v13, %v1563_v11  ;;  %v1596_v37 = vpack.c.bf16 %v4411_v44, %v4408_v31 }
 0x3da   : > { %v1542_v36 = vpack.c.bf16 %v1538_v20, %v1537_v4  ;;  %v1550_v42 = vrot.slane %v1538_v20, 7  ;;  %v1552_v43 = vsel %vm844_vm3, %v1548_v12, %v1549_v63  ;;  %v1580_v38 = vsel %vm913_vm4, %v1576_v51, %v1577_v17 }
 0x3db   : > { %v1565_v8 = vmul.f32 %v1552_v43, %v4157_v53  ;;  %v1592_v0 = vmul.f32 %v1580_v38, %v4200_v59  ;;  %v1578_v26 = vrot.slane %v1538_v20, 1  ;;  %3111 = vmatpush3.bf16.msra.mxu1 %v3351_v18 }
 0x3dc   : > { %3099 = vmatmul.mubr.bf16.gmra.mrb[4].mxu1 %v1542_v36  ;;  %v1558_v49 = vsel %vm844_vm3, %v1550_v42, %v1543_v34  ;;  %v1551_v14 = vsel %vm844_vm3, %v1549_v63, %v1550_v42  ;;  %3112 = vmatprep.subr.bf16.mxu1 %v3352_v3 }
 0x3dd   : > { %v1559_v53 = vmul.f32 %v1558_v49, %v4120_v24  ;;  %v1566_v57 = vmul.f32 %v1551_v14, %v4155_v50  ;;  %v1597_v59 = vpack.c.bf16 %v1592_v0, %v1591_v62  ;;  %v1579_v5 = vsel %vm913_vm4, %v1577_v17, %v1578_v26 }
 0x3de   : > { %v1586_v22 = vsel %vm913_vm4, %v1578_v26, %v1571_v45  ;;  %v1593_v34 = vmul.f32 %v1579_v5, %v4215_v28  ;;  %v3356_v45 = vld [vmem:[%s3996_s22 + $0x88] sm:$0xff]   ;;  %v3357_v28 = vld [vmem:[%s3996_s22 + $0x90] sm:$0xff]  }
 0x3df   : > { %v1567_v56 = vpack.c.bf16 %v1560_v19, %v1559_v53  ;;  %v1570_v30 = vpack.c.bf16 %v1566_v57, %v1565_v8  ;;  %v1594_v24 = vmul.f32 %v1586_v22, %v4217_v29  ;;  %3113 = vmatpush3.bf16.msra.mxu1 %v3352_v3  ;;  %v3358_v29 = vld [vmem:[%s3996_s22 + $0x98] sm:$0xff]   ;;  %v2102_v22 = vsub.s32 2, %v4097_v58 }
 0x3e0   : > { %3114 = vmatprep.subr.bf16.mxu1 %v3353_v32 }
 0x3e1   : > { %3118 = vmatprep.mubr.bf16.mxu1 %v1567_v56  ;;  %v1598_v50 = vpack.c.bf16 %v1594_v24, %v1593_v34 }
 0x3e3   : > { %3115 = vmatpush3.bf16.msra.mxu1 %v3353_v32 }
 0x3e4   : > { %3116 = vmatprep.subr.bf16.mxu1 %v3354_v10 }
 0x3e7   : > { %3117 = vmatpush3.bf16.msra.mxu1 %v3354_v10 }
 0x3e8   : > { %3126 = vmatprep.subr.bf16.mxu1 %v3355_v46 }
 0x3ea   : > { %3119 = vmatmul.mubr.bf16.vlgmr.msra.gmra.mrb[0].mxu1 %v1568_v60  ;;  %v3362_v60 = vld [vmem:[%s3996_s22 + $0xb8] sm:$0xff]  }
 0x3eb   : > { %3122 = vmatprep.mubr.bf16.mxu1 %v1569_v61  ;;  %3127 = vmatpush3.bf16.msra.mxu1 %v3355_v46  ;;  %v4512_v46 = vrot.slane %v4291_v55, %v2102_v22 }
 0x3ec   : > { %3128 = vmatprep.subr.bf16.mxu1 %v3356_v45 }
 0x3ef   : > { %3129 = vmatpush3.bf16.msra.mxu1 %v3356_v45 }
 0x3f0   : > { %3130 = vmatprep.subr.bf16.mxu1 %v3357_v28 }
 0x3f2   : > { %3123 = vmatmul.mubr.bf16.gmra.mrb[4].mxu1 %v1570_v30  ;;  %v2114_v30 = vsub.s32 3, %v4097_v58 }
 0x3f3   : > { %3131 = vmatpush3.bf16.msra.mxu1 %v3357_v28  ;;  %3142 = vmatprep.mubr.bf16.mxu1 %v1595_v33 }
 0x3f4   : > { %3132 = vmatprep.subr.bf16.mxu1 %v3358_v29 }
 0x3f7   : > { %3133 = vmatpush3.bf16.msra.mxu1 %v3358_v29 }
 0x3f8   : > { %3134 = vmatprep.subr.bf16.mxu1 %v3359_v2 }
 0x3fb   : > { %3135 = vmatpush3.bf16.msra.mxu1 %v3359_v2 }
 0x3fc   : > { %3136 = vmatprep.subr.bf16.mxu1 %v3360_v25 }
 0x3ff   : > { %3137 = vmatpush3.bf16.msra.mxu1 %v3360_v25 }
 0x400   : > { %3138 = vmatprep.subr.bf16.mxu1 %v3361_v27 }
 0x403   : > { %3139 = vmatpush3.bf16.msra.mxu1 %v3361_v27 }
 0x404   : > { %3140 = vmatprep.subr.bf16.mxu1 %v3362_v60 }
 0x407   : > { %3141 = vmatpush3.bf16.msra.mxu1 %v3362_v60  ;;  %v4520_v60 = vrot.slane %v4291_v55, %v2114_v30 }
 0x40a   : > { %3143 = vmatmul.mubr.bf16.vlgmr.msra.gmra.mrb[0].mxu1 %v1596_v37 }
 0x40b   : > { %3146 = vmatprep.mubr.bf16.mxu1 %v1597_v59 }
 0x412   : > { %3147 = vmatmul.mubr.bf16.gmra.mrb[4].mxu1 %v1598_v50 }
 0x4dd   : > { %v4460_v48 = vpop.f32.mrb[0].mxu1 }
 0x4de   : > { %2000 = vadd.xlane.f32.xlu0 %v4460_v48  ;;  %v4463_v39 = vpop.f32.mrb[1].mxu1  ;;  %v2022_v21 = vmul.f32 %v4460_v48, %v4460_v48 }
 0x4df   : > { %v4465_v7 = vpop.f32.mrb[2].mxu1  ;;  %v2020_v41 = vmul.f32 %v4463_v39, %v4463_v39 }
 0x4e0   : > { %2002 = vadd.xlane.f32.xlu1 %v4465_v7  ;;  %v4468_v33 = vpop.f32.mrb[3].mxu1  ;;  %v2023_v40 = vmul.f32 %v4465_v7, %v4465_v7 }
 0x4e1   : > { %v2021_v12 = vmul.f32 %v4468_v33, %v4468_v33 }
 0x4e2   : > { %1996 = vadd.xlane.f32.xlu0 %v4463_v39 }
 0x4e4   : > { %1998 = vadd.xlane.f32.xlu1 %v4468_v33 }
 0x4e5   : > { %v4474_v47 = vpop.f32.mrb[4].mxu1 }
 0x4e6   : > { %2032 = vadd.xlane.f32.xlu0 %v2022_v21  ;;  %v4476_v54 = vpop.f32.mrb[5].mxu1  ;;  %v2026_v52 = vmul.f32 %v4474_v47, %v4474_v47 }
 0x4e7   : > { %v4480_v15 = vpop.f32.mrb[6].mxu1  ;;  %v2024_v18 = vmul.f32 %v4476_v54, %v4476_v54 }
 0x4e8   : > { %2034 = vadd.xlane.f32.xlu1 %v2023_v40  ;;  %v4482_v6 = vpop.f32.mrb[7].mxu1  ;;  %v2027_v51 = vmul.f32 %v4480_v15, %v4480_v15 }
 0x4e9   : > { %v2025_v35 = vmul.f32 %v4482_v6, %v4482_v6 }
 0x4ea   : > { %2028 = vadd.xlane.f32.xlu0 %v2020_v41 }
 0x4ec   : > { %2030 = vadd.xlane.f32.xlu1 %v2021_v12 }
 0x4ee   : > { %2008 = vadd.xlane.f32.xlu0 %v4474_v47 }
 0x4f0   : > { %2010 = vadd.xlane.f32.xlu1 %v4480_v15 }
 0x4f2   : > { %2004 = vadd.xlane.f32.xlu0 %v4476_v54 }
 0x4f4   : > { %2006 = vadd.xlane.f32.xlu1 %v4482_v6 }
 0x4f6   : > { %2036 = vadd.xlane.f32.xlu0 %v2024_v18 }
 0x4f8   : > { %2038 = vadd.xlane.f32.xlu1 %v2025_v35 }
 0x4fa   : > { %2040 = vadd.xlane.f32.xlu0 %v2026_v52 }
 0x4fc   : > { %2042 = vadd.xlane.f32.xlu1 %v2027_v51 }
 0x56b   : > { %v2001_v16 = vpop.xlane.xlu0 %2000 }
 0x56c   : > { %v2014_v11 = vmul.f32 0.03125, %v2001_v16 }
 0x56d   : > { %v2003_v4 = vpop.xlane.xlu1 %2002 }
 0x56e   : > { %v2015_v31 = vmul.f32 0.03125, %v2003_v4  ;;  %v2054_v23 = vmul.f32 %v2014_v11, %v2014_v11  ;;  %v2070_v10 = vsub.f32 %v4460_v48, %v2014_v11 }
 0x56f   : > { %v1997_v9 = vpop.xlane.xlu0 %1996 }
 0x570   : > { %v2012_v20 = vmul.f32 0.03125, %v1997_v9  ;;  %v2055_v37 = vmul.f32 %v2015_v31, %v2015_v31  ;;  %v2071_v27 = vsub.f32 %v4465_v7, %v2015_v31 }
 0x571   : > { %v1999_v13 = vpop.xlane.xlu1 %1998 }
 0x572   : > { %v4500_v17 = vmul.f32 0.03125, %v1999_v13  ;;  %v2052_v43 = vmul.f32 %v2012_v20, %v2012_v20  ;;  %v2068_v52 = vsub.f32 %v4463_v39, %v2012_v20 }
 0x573   : > { %v2033_v44 = vpop.xlane.xlu0 %2032 }
 0x574   : > { %v2046_v63 = vmul.f32 0.03125, %v2033_v44  ;;  %v2053_v0 = vmul.f32 %v4500_v17, %v4500_v17  ;;  %v2069_v51 = vsub.f32 %v4468_v33, %v4500_v17 }
 0x575   : > { %v2035_v61 = vpop.xlane.xlu1 %2034 }
 0x576   : > { %v2062_v36 = vsub.f32 %v2046_v63, %v2054_v23  ;;  %v2047_v3 = vmul.f32 0.03125, %v2035_v61 }
 0x577   : > { %v2029_v42 = vpop.xlane.xlu0 %2028 }
 0x578   : > { %v2078_v38 = vadd.f32 1e-05, %v2062_v36  ;;  %v2063_v8 = vsub.f32 %v2047_v3, %v2055_v37  ;;  %v2044_v62 = vmul.f32 0.03125, %v2029_v42  ;;  %v3427_v36 = vld [vmem:[#allocation2 + $0x10] sm:$0xff] }
 0x579   : > { %v2031_v26 = vpop.xlane.xlu1 %2030 }
 0x57a   : > { %3395 = vrsqrt.f32 %v2078_v38  ;;  %v2079_v49 = vadd.f32 1e-05, %v2063_v8  ;;  %v2060_v19 = vsub.f32 %v2044_v62, %v2052_v43  ;;  %v2045_v14 = vmul.f32 0.03125, %v2031_v26  ;;  %v3428_v26 = vld [vmem:[#allocation2 + $0x18] sm:$0xff] }
 0x57b   : > { %v2009_v53 = vpop.xlane.xlu0 %2008 }
 0x57c   : > { %3397 = vrsqrt.f32 %v2079_v49  ;;  %v2076_v57 = vadd.f32 1e-05, %v2060_v19  ;;  %v2061_v59 = vsub.f32 %v2045_v14, %v2053_v0  ;;  %v4514_v29 = vmul.f32 0.03125, %v2009_v53 }
 0x57d   : > { %v2011_v5 = vpop.xlane.xlu1 %2010 }
 0x57e   : > { %3399 = vrsqrt.f32 %v2076_v57  ;;  %v2077_v32 = vadd.f32 1e-05, %v2061_v59  ;;  %v4522_v40 = vmul.f32 0.03125, %v2011_v5  ;;  %v2058_v9 = vmul.f32 %v4514_v29, %v4514_v29  ;;  %v3429_v59 = vld [vmem:[#allocation2] sm:$0xff] }
 0x57f   : > { %v2005_v34 = vpop.xlane.xlu0 %2004 }
 0x580   : > { %3401 = vrsqrt.f32 %v2077_v32  ;;  %v4505_v56 = vmul.f32 0.03125, %v2005_v34  ;;  %v2059_v39 = vmul.f32 %v4522_v40, %v4522_v40  ;;  %v3430_v34 = vld [vmem:[#allocation2 + $0x8] sm:$0xff] }
 0x581   : > { %v2007_v24 = vpop.xlane.xlu1 %2006 }
 0x582   : > { %v4508_v50 = vmul.f32 0.03125, %v2007_v24  ;;  %v2056_v2 = vmul.f32 %v4505_v56, %v4505_v56  ;;  %v2072_v24 = vsub.f32 %v4476_v54, %v4505_v56 }
 0x583   : > { %v2037_v45 = vpop.xlane.xlu0 %2036 }
 0x584   : > { %v3396_v28 = vpop.eup %3395  ;;  %v2048_v25 = vmul.f32 0.03125, %v2037_v45  ;;  %v2057_v12 = vmul.f32 %v4508_v50, %v4508_v50 }
 0x585   : > { %v2094_v21 = vmul.f32 %v3396_v28, %v2070_v10  ;;  %v2039_v48 = vpop.xlane.xlu1 %2038  ;;  %v2073_v28 = vsub.f32 %v4482_v6, %v4508_v50 }
 0x586   : > { %v3398_v41 = vpop.eup %3397  ;;  %v2064_v18 = vsub.f32 %v2048_v25, %v2056_v2  ;;  %v2049_v35 = vmul.f32 0.03125, %v2039_v48 }
 0x587   : > { %v2106_v7 = vmul.f32 %v4512_v46, %v2094_v21  ;;  %v2095_v16 = vmul.f32 %v3398_v41, %v2071_v27  ;;  %v2041_v55 = vpop.xlane.xlu0 %2040  ;;  %v2074_v27 = vsub.f32 %v4474_v47, %v4514_v29 }
 0x588   : > { %v3400_v4 = vpop.eup %3399  ;;  %v2080_v11 = vadd.f32 1e-05, %v2064_v18  ;;  %v2065_v13 = vsub.f32 %v2049_v35, %v2057_v12  ;;  %v2050_v31 = vmul.f32 0.03125, %v2041_v55  ;;  %v2075_v18 = vsub.f32 %v4480_v15, %v4522_v40 }
 0x589   : > { %v2118_v44 = vadd.f32 %v4520_v60, %v2106_v7  ;;  %v2107_v23 = vmul.f32 %v4512_v46, %v2095_v16  ;;  %v2092_v63 = vmul.f32 %v3400_v4, %v2068_v52  ;;  %v2043_v33 = vpop.xlane.xlu1 %2042  ;;  %v3431_v7 = vld [vmem:[#allocation2 + $0x20] sm:$0xff] }
 0x58a   : > { %v3402_v20 = vpop.eup %3401  ;;  %3403 = vrsqrt.f32 %v2080_v11  ;;  %v2081_v17 = vadd.f32 1e-05, %v2065_v13  ;;  %v2066_v61 = vsub.f32 %v2050_v31, %v2058_v9  ;;  %v2051_v37 = vmul.f32 0.03125, %v2043_v33  ;;  %v3432_v13 = vld [vmem:[#allocation2 + $0x28] sm:$0xff] }
 0x58b   : > { %v2126_v3 = vadd.f32 %v3427_v36, %v2118_v44  ;;  %v2119_v42 = vadd.f32 %v4520_v60, %v2107_v23  ;;  %v2104_v43 = vmul.f32 %v4512_v46, %v2092_v63  ;;  %v2093_v38 = vmul.f32 %v3402_v20, %v2069_v51 }
 0x58c   : > { %3405 = vrsqrt.f32 %v2081_v17  ;;  %v2082_v8 = vadd.f32 1e-05, %v2066_v61  ;;  %v2067_v62 = vsub.f32 %v2051_v37, %v2059_v39  ;;  %v3433_v17 = vld [vmem:[#allocation2 + $0x30] sm:$0xff] }
 0x58d   : > { %v2142_v0 = vmul.f32 0.70710677, %v2126_v3  ;;  %v2127_v49 = vadd.f32 %v3428_v26, %v2119_v42  ;;  %v2116_v19 = vadd.f32 %v4520_v60, %v2104_v43  ;;  %v2105_v14 = vmul.f32 %v4512_v46, %v2093_v38 }
 0x58e   : > { %3407 = vrsqrt.f32 %v2082_v8  ;;  %v2083_v53 = vadd.f32 1e-05, %v2067_v62  ;;  %v2134_v50 = vmul.f32 0.5, %v2126_v3  ;;  %v3434_v8 = vld [vmem:[#allocation2 + $0x38] sm:$0xff] }
 0x58f   : > { %3409 = verf.f32 %v2142_v0  ;;  %v2143_v57 = vmul.f32 0.70710677, %v2127_v49  ;;  %v2124_v5 = vadd.f32 %v3429_v59, %v2116_v19  ;;  %v2117_v32 = vadd.f32 %v4520_v60, %v2105_v14 }
 0x590   : > { %3411 = vrsqrt.f32 %v2083_v53  ;;  %v2135_v9 = vmul.f32 0.5, %v2127_v49 }
 0x591   : > { %3413 = verf.f32 %v2143_v57  ;;  %v2140_v22 = vmul.f32 0.70710677, %v2124_v5  ;;  %v2125_v30 = vadd.f32 %v3430_v34, %v2117_v32  ;;  %v2132_v63 = vmul.f32 0.5, %v2124_v5 }
 0x593   : > { %3415 = verf.f32 %v2140_v22  ;;  %v2141_v45 = vmul.f32 0.70710677, %v2125_v30  ;;  %v2133_v42 = vmul.f32 0.5, %v2125_v30 }
 0x594   : > { %v3404_v10 = vpop.eup %3403 }
 0x595   : > { %v2096_v2 = vmul.f32 %v3404_v10, %v2072_v24  ;;  %3417 = verf.f32 %v2141_v45 }
 0x596   : > { %v3406_v25 = vpop.eup %3405 }
 0x597   : > { %v2108_v21 = vmul.f32 %v4512_v46, %v2096_v2  ;;  %v2097_v48 = vmul.f32 %v3406_v25, %v2073_v28  ;;  %v2900_v28 = vld [vmem:[%s4811_s9] ss:$0 sm:$0xff] (!%p2899_p13) }
 0x598   : > { %v3408_v41 = vpop.eup %3407 }
 0x599   : > { %v3410_v12 = vpop.eup %3409  ;;  %v2120_v54 = vadd.f32 %v4520_v60, %v2108_v21  ;;  %v2109_v56 = vmul.f32 %v4512_v46, %v2097_v48  ;;  %v2098_v35 = vmul.f32 %v3408_v41, %v2074_v27 }
 0x59a   : > { %v3412_v6 = vpop.eup %3411  ;;  %v2158_v52 = vadd.f32 1.0, %v3410_v12 }
 0x59b   : > { %v3414_v51 = vpop.eup %3413  ;;  %v2128_v16 = vadd.f32 %v3431_v7, %v2120_v54  ;;  %v2121_v47 = vadd.f32 %v4520_v60, %v2109_v56  ;;  %v2110_v29 = vmul.f32 %v4512_v46, %v2098_v35  ;;  %v2099_v55 = vmul.f32 %v3412_v6, %v2075_v18  ;;  %v2901_v56 = vld [vmem:[#allocation3] ss:$0 sm:$0xff] (!%p2899_p13)  ;;  %v4872_v7 = vld [vmem:[#allocation27_spill] sm:$0xff] (!%p2899_p13) }
 0x59c   : > { %v4554_v4 = vmul.f32 %v2158_v52, %v2134_v50  ;;  %v2159_v15 = vadd.f32 1.0, %v3414_v51  ;;  %v3686_v54 = vmov (!%p2899_p13), 0   ;;  %vm2231_vm6 = vcmp.gt.f32.partialorder (!%p2899_p13), %v4872_v7, 0.0 }
 0x59d   : > { %v3416_v40 = vpop.eup %3415  ;;  %v2144_v11 = vmul.f32 0.70710677, %v2128_v16  ;;  %v2129_v31 = vadd.f32 %v3432_v13, %v2121_v47  ;;  %v2122_v44 = vadd.f32 %v4520_v60, %v2110_v29  ;;  %v2111_v33 = vmul.f32 %v4512_v46, %v2099_v55  ;;  %3435 = vset.pattern.permute.xlu0 (!%p2899_p13), %v3686_v54  ;;  %3436 = vset.pattern.permute.xlu1 (!%p2899_p13), %v3686_v54  ;;  %v4873_v55 = vld [vmem:[#allocation30_spill] sm:$0xff] (!%p2899_p13) }
 0x59e   : > { %2174 = vst [vmem:[#allocation2 + $0x10] sm:$0xff] %v4554_v4  ;;  %v4558_v23 = vmul.f32 %v2159_v15, %v2135_v9  ;;  %v2156_v39 = vadd.f32 1.0, %v3416_v40  ;;  %v2136_v49 = vmul.f32 0.5, %v2128_v16  ;;  %2529 = vst [vmem:[%s4003_s28 + $0x10] sm:$0xff] (!%p2899_p13), %v4554_v4  ;;  %v2193_v48 = vmul.f32 (!%p2899_p13), %v2900_v28, %v4554_v4  ;;  %v4874_v40 = vld [vmem:[#allocation31_spill] sm:$0xff] (!%p2899_p13) }
 0x59f   : > { %3419 = verf.f32 %v2144_v11  ;;  %v2145_v20 = vmul.f32 0.70710677, %v2129_v31  ;;  %v2130_v61 = vadd.f32 %v3433_v17, %v2122_v44  ;;  %v3418_v37 = vpop.eup %3417  ;;  %v2123_v3 = vadd.f32 %v4520_v60, %v2111_v33 }
 0x5a0   : > { %2175 = vst [vmem:[#allocation2 + $0x18] sm:$0xff] %v4558_v23  ;;  %v4562_v36 = vmul.f32 %v2156_v39, %v2132_v63  ;;  %v2157_v43 = vadd.f32 1.0, %v3418_v37  ;;  %v2137_v53 = vmul.f32 0.5, %v2129_v31  ;;  %2530 = vst [vmem:[%s4003_s28 + $0x18] sm:$0xff] (!%p2899_p13), %v4558_v23  ;;  %v2194_v12 = vmul.f32 (!%p2899_p13), %v2900_v28, %v4558_v23  ;;  %v4875_v63 = vld [vmem:[#allocation28_spill] sm:$0xff] (!%p2899_p13) }
 0x5a1   : > { %3421 = verf.f32 %v2145_v20  ;;  %v2146_v38 = vmul.f32 0.70710677, %v2130_v61  ;;  %v2131_v62 = vadd.f32 %v3434_v8, %v2123_v3  ;;  %v2138_v32 = vmul.f32 0.5, %v2130_v61  ;;  %v4876_v20 = vld [vmem:[#allocation32_spill] sm:$0xff] (!%p2899_p13)  ;;  %v4878_v8 = vld [vmem:[#allocation33_spill] sm:$0xff] (!%p2899_p13) }
 0x5a2   : > { %2172 = vst [vmem:[#allocation2] sm:$0xff] %v4562_v36  ;;  %v4566_v46 = vmul.f32 %v2157_v43, %v2133_v42  ;;  %2527 = vst [vmem:[%s4003_s28] sm:$0xff] (!%p2899_p13), %v4562_v36  ;;  %v2191_v2 = vmul.f32 (!%p2899_p13), %v2900_v28, %v4562_v36  ;;  %vm2234_vm7 = vcmp.gt.f32.partialorder (!%p2899_p13), %v4873_v55, 0.0  ;;  %vm2235_vm8 = vcmp.gt.f32.partialorder (!%p2899_p13), %v4874_v40, 0.0  ;;  %v4877_v42 = vld [vmem:[#allocation29_spill] sm:$0xff] (!%p2899_p13) }
 0x5a3   : > { %3423 = verf.f32 %v2146_v38  ;;  %v2147_v0 = vmul.f32 0.70710677, %v2131_v62  ;;  %v2139_v24 = vmul.f32 0.5, %v2131_v62  ;;  %vm2232_vm9 = vcmp.gt.f32.partialorder (!%p2899_p13), %v4875_v63, 0.0 }
 0x5a4   : > { %2173 = vst [vmem:[#allocation2 + $0x8] sm:$0xff] %v4566_v46  ;;  %2528 = vst [vmem:[%s4003_s28 + $0x8] sm:$0xff] (!%p2899_p13), %v4566_v46  ;;  %2199 = vadd.xlane.f32.xlu0 (!%p2899_p13), %v2191_v2  ;;  %v2192_v27 = vmul.f32 (!%p2899_p13), %v2900_v28, %v4566_v46  ;;  %vm2236_vm10 = vcmp.gt.f32.partialorder (!%p2899_p13), %v4876_v20, 0.0  ;;  %vm2233_vm11 = vcmp.gt.f32.partialorder (!%p2899_p13), %v4877_v42, 0.0  ;;  %vm2237_vm12 = vcmp.gt.f32.partialorder (!%p2899_p13), %v4878_v8, 0.0 }
 0x5a5   : > { %3425 = verf.f32 %v2147_v0 }
 0x5a8   : > { %2201 = vadd.xlane.f32.xlu0 (!%p2899_p13), %v2192_v27 }
 0x5a9   : > { %v3420_v26 = vpop.eup %3419 }
 0x5aa   : > { %v2160_v19 = vadd.f32 1.0, %v3420_v26 }
 0x5ab   : > { %v3422_v14 = vpop.eup %3421 }
 0x5ac   : > { %v4569_v60 = vmul.f32 %v2160_v19, %v2136_v49  ;;  %v2161_v57 = vadd.f32 1.0, %v3422_v14  ;;  %2203 = vadd.xlane.f32.xlu0 (!%p2899_p13), %v2193_v48  ;;  %v4879_v19 = vlaneseq (!%p2899_p13) }
 0x5ad   : > { %v3424_v59 = vpop.eup %3423 }
 0x5ae   : > { %2176 = vst [vmem:[#allocation2 + $0x20] sm:$0xff] %v4569_v60  ;;  %v4572_v5 = vmul.f32 %v2161_v57, %v2137_v53  ;;  %v2162_v22 = vadd.f32 1.0, %v3424_v59  ;;  %2183 = sbr.rel (%p2899_p13) target bundleno = 2400 (0x960), region = 84  ;;  %2531 = vst [vmem:[%s4003_s28 + $0x20] sm:$0xff] (!%p2899_p13), %v4569_v60  ;;  %v2195_v25 = vmul.f32 (!%p2899_p13), %v2900_v28, %v4569_v60  ;;  %v2279_v14 = vand.u32 (!%p2899_p13), 127, %v4879_v19 }
 0x5af   : > { %v3426_v34 = vpop.eup %3425 }
 0x5b0   : > { %2177 = vst [vmem:[#allocation2 + $0x28] sm:$0xff] %v4572_v5  ;;  %v4575_v30 = vmul.f32 %v2162_v22, %v2138_v32  ;;  %v2163_v10 = vadd.f32 1.0, %v3426_v34  ;;  %2532 = vst [vmem:[%s4003_s28 + $0x28] sm:$0xff] (!%p2899_p13), %v4572_v5  ;;  %2207 = vadd.xlane.f32.xlu1 (!%p2899_p13), %v2195_v25  ;;  %v2196_v21 = vmul.f32 (!%p2899_p13), %v2900_v28, %v4572_v5  ;;  %2205 = vadd.xlane.f32.xlu0 (!%p2899_p13), %v2194_v12 }
 0x5b1   : > { %v2284_v57 = vadd.s32 (!%p2899_p13), 4294967288, %v2279_v14  ;;  %v2291_v59 = vadd.s32 (!%p2899_p13), 4294967280, %v2279_v14  ;;  %v2298_v32 = vadd.s32 (!%p2899_p13), 4294967272, %v2279_v14 }
 0x5b2   : > { %2178 = vst [vmem:[#allocation2 + $0x30] sm:$0xff] %v4575_v30  ;;  %v4578_v45 = vmul.f32 %v2163_v10, %v2139_v24  ;;  %2533 = vst [vmem:[%s4003_s28 + $0x30] sm:$0xff] (!%p2899_p13), %v4575_v30  ;;  %v2197_v41 = vmul.f32 (!%p2899_p13), %v2900_v28, %v4575_v30  ;;  %v4649_v10 = vsub.s32 (!%p2899_p13), %v2279_v14, %v4097_v58 }
 0x5b3   : > { %v4643_v34 = vsub.s32 (!%p2899_p13), %v2284_v57, %v4097_v58  ;;  %v4646_v24 = vsub.s32 (!%p2899_p13), %v2291_v59, %v4097_v58 }
 0x5b4   : > { %2179 = vst [vmem:[#allocation2 + $0x38] sm:$0xff] %v4578_v45  ;;  %2534 = vst [vmem:[%s4003_s28 + $0x38] sm:$0xff] (!%p2899_p13), %v4578_v45  ;;  %2209 = vadd.xlane.f32.xlu1 (!%p2899_p13), %v2196_v21  ;;  %v2198_v18 = vmul.f32 (!%p2899_p13), %v2900_v28, %v4578_v45  ;;  %v4652_v28 = vsub.s32 (!%p2899_p13), %v2298_v32, %v4097_v58 }
 0x5b8   : > { %2211 = vadd.xlane.f32.xlu1 %v2197_v41 }
 0x5bc   : > { %2213 = vadd.xlane.f32.xlu1 %v2198_v18 }
 0x631   : > { %v2200_v35 = vpop.xlane.xlu0 %2199 }
 0x632   : > { %v2222_v50 = vadd.f32 %v2901_v56, %v2200_v35 }
 0x634   : > { %v4610_v52 = vsel %vm2230_vm5, %v2222_v50, -1e+30 }
 0x635   : > { %2255 = vperm.xlu0 %3435, %v4610_v52   ;;  %v2202_v51 = vpop.xlane.xlu0 %2201 }
 0x636   : > { %v2223_v16 = vadd.f32 %v2901_v56, %v2202_v51 }
 0x638   : > { %v4615_v9 = vsel %vm2231_vm6, %v2223_v16, -1e+30 }
 0x639   : > { %2258 = vperm.xlu1 %3436, %v4615_v9   ;;  %v2204_v11 = vpop.xlane.xlu0 %2203 }
 0x63a   : > { %v2224_v31 = vadd.f32 %v2901_v56, %v2204_v11  ;;  %v4881_v11 = vld [vmem:[#allocation35_spill] sm:$0xff] }
 0x63c   : > { %v4626_v33 = vsel %vm2232_vm9, %v2224_v31, -1e+30 }
 0x63d   : > { %v2208_v6 = vpop.xlane.xlu1 %2207  ;;  %v2206_v17 = vpop.xlane.xlu0 %2205 }
 0x63e   : > { %v2226_v47 = vadd.f32 %v2901_v56, %v2208_v6  ;;  %v2225_v37 = vadd.f32 %v2901_v56, %v2206_v17 }
 0x640   : > { %v4618_v1 = vsel %vm2234_vm7, %v2226_v47, -1e+30  ;;  %v4634_v38 = vsel %vm2233_vm11, %v2225_v37, -1e+30 }
 0x641   : > { %v2210_v29 = vpop.xlane.xlu1 %2209  ;;  %2267 = vperm.xlu1 %3436, %v4618_v1  }
 0x642   : > { %v2227_v15 = vadd.f32 %v2901_v56, %v2210_v29 }
 0x644   : > { %v4622_v13 = vsel %vm2235_vm8, %v2227_v15, -1e+30  ;;  %v4880_v15 = vld [vmem:[#allocation34_spill] sm:$0xff] }
 0x645   : > { %v2212_v44 = vpop.xlane.xlu1 %2211  ;;  %2270 = vperm.xlu1 %3436, %v4622_v13  }
 0x646   : > { %v2228_v39 = vadd.f32 %v2901_v56, %v2212_v44 }
 0x648   : > { %v4630_v61 = vsel %vm2236_vm10, %v2228_v39, -1e+30 }
 0x649   : > { %2261 = vperm.xlu1 %3436, %v4626_v33   ;;  %v2214_v3 = vpop.xlane.xlu1 %2213 }
 0x64a   : > { %v2229_v43 = vadd.f32 %v2901_v56, %v2214_v3 }
 0x64c   : > { %v4638_v62 = vsel %vm2237_vm12, %v2229_v43, -1e+30 }
 0x64d   : > { %2273 = vperm.xlu1 %3436, %v4630_v61  }
 0x651   : > { %2264 = vperm.xlu1 %3436, %v4634_v38  }
 0x655   : > { %2276 = vperm.xlu1 %3436, %v4638_v62  }
 0x6b4   : > { %v2256_v2 = vpop.permute.xlu0 %2255 }
 0x6b5   : > { %v2283_v12 = vrot.slane %v2256_v2, %v4649_v10 }
 0x6b8   : > { %v2259_v0 = vpop.permute.xlu1 %2258 }
 0x6b9   : > { %v2288_v27 = vrot.slane %v2259_v0, %v4643_v34 }
 0x6bb   : > { %v2290_v56 = vsel %vm2289_vm13, %v2288_v27, %v2283_v12 }
 0x6c0   : > { %v2268_v26 = vpop.permute.xlu1 %2267 }
 0x6c1   : > { %v2308_v18 = vrot.slane %v2268_v26, %v4649_v10 }
 0x6c4   : > { %v2271_v49 = vpop.permute.xlu1 %2270 }
 0x6c5   : > { %v2312_v21 = vrot.slane %v2271_v49, %v4643_v34 }
 0x6c7   : > { %v2313_v35 = vsel %vm2289_vm13, %v2312_v21, %v2308_v18 }
 0x6c8   : > { %v2262_v53 = vpop.permute.xlu1 %2261 }
 0x6c9   : > { %v2295_v48 = vrot.slane %v2262_v53, %v4646_v24 }
 0x6cb   : > { %v2297_v50 = vsel %vm2296_vm14, %v2295_v48, %v2290_v56 }
 0x6cc   : > { %v2274_v22 = vpop.permute.xlu1 %2273 }
 0x6cd   : > { %v2317_v41 = vrot.slane %v2274_v22, %v4646_v24 }
 0x6cf   : > { %v2318_v51 = vsel %vm2296_vm14, %v2317_v41, %v2313_v35 }
 0x6d0   : > { %v2265_v25 = vpop.permute.xlu1 %2264 }
 0x6d1   : > { %v2302_v54 = vrot.slane %v2265_v25, %v4652_v28 }
 0x6d3   : > { %v2304_v7 = vsel %vm2303_vm15, %v2302_v54, %v2297_v50 }
 0x6d4   : > { %v2277_v58 = vpop.permute.xlu1 %2276 }
 0x6d5   : > { %v2322_v6 = vrot.slane %v2277_v58, %v4652_v28 }
 0x6d7   : > { %v2323_v16 = vsel %vm2303_vm15, %v2322_v6, %v2318_v51 }
 0x6d8   : > { %v2325_v47 = vsel %vm2324_vm0, %v2323_v16, %v2304_v7 }
 0x6d9   : > { %v2328_v29 = vsel %vm2327_vm1, %v2325_v47, -inf }
 0x6da   : > { %2329 = vmax.xlane.f32.xlu1 %v2328_v29 }
 0x767   : > { %v2330_v55 = vpop.xlane.xlu1 %2329 }
 0x768   : > { %v2335_v40 = vrot.slane %v2330_v55, %v4880_v15  ;;  %v2339_v31 = vrot.slane %v2330_v55, %v4881_v11 }
 0x76a   : > { %v2342_v44 = vsub.f32 %v4610_v52, %v2335_v40  ;;  %v2343_v63 = vsub.f32 %v4615_v9, %v2335_v40  ;;  %v2346_v20 = vsub.f32 %v4618_v1, %v2339_v31  ;;  %v2347_v37 = vsub.f32 %v4622_v13, %v2339_v31 }
 0x76b   : > { %v2344_v42 = vsub.f32 %v4626_v33, %v2335_v40  ;;  %v2348_v0 = vsub.f32 %v4630_v61, %v2339_v31  ;;  %v2345_v1 = vsub.f32 %v4634_v38, %v2335_v40  ;;  %v2349_v13 = vsub.f32 %v4638_v62, %v2339_v31 }
 0x76c   : > { %v2350_v39 = vmul.f32 1.442695, %v2342_v44  ;;  %v2352_v17 = vmul.f32 1.442695, %v2343_v63  ;;  %v2358_v3 = vmul.f32 1.442695, %v2346_v20 }
 0x76d   : > { %v2360_v43 = vmul.f32 1.442695, %v2347_v37  ;;  %v2354_v52 = vmul.f32 1.442695, %v2344_v42  ;;  %v2362_v26 = vmul.f32 1.442695, %v2348_v0 }
 0x76e   : > { %3437 = vpow2.f32 %v2350_v39  ;;  %v2356_v19 = vmul.f32 1.442695, %v2345_v1  ;;  %v2364_v14 = vmul.f32 1.442695, %v2349_v13 }
 0x76f   : > { %3439 = vpow2.f32 %v2352_v17 }
 0x770   : > { %3441 = vpow2.f32 %v2358_v3 }
 0x771   : > { %3443 = vpow2.f32 %v2360_v43 }
 0x772   : > { %3445 = vpow2.f32 %v2354_v52 }
 0x773   : > { %3447 = vpow2.f32 %v2362_v26 }
 0x774   : > { %3449 = vpow2.f32 %v2356_v19 }
 0x775   : > { %3451 = vpow2.f32 %v2364_v14 }
 0x778   : > { %v3438_v8 = vpop.eup %3437 }
 0x779   : > { %2375 = vperm.xlu0 %3435, %v3438_v8   ;;  %v3440_v9 = vpop.eup %3439 }
 0x77a   : > { %v3442_v49 = vpop.eup %3441 }
 0x77b   : > { %v3444_v33 = vpop.eup %3443 }
 0x77c   : > { %v3446_v53 = vpop.eup %3445 }
 0x77d   : > { %2378 = vperm.xlu0 %3435, %v3440_v9   ;;  %v3448_v61 = vpop.eup %3447 }
 0x77e   : > { %v3450_v57 = vpop.eup %3449 }
 0x77f   : > { %v3452_v38 = vpop.eup %3451 }
 0x781   : > { %2387 = vperm.xlu0 %3435, %v3442_v49  }
 0x785   : > { %2390 = vperm.xlu0 %3435, %v3444_v33  }
 0x789   : > { %2381 = vperm.xlu0 %3435, %v3446_v53  }
 0x78d   : > { %2393 = vperm.xlu0 %3435, %v3448_v61  }
 0x791   : > { %2384 = vperm.xlu0 %3435, %v3450_v57  }
 0x795   : > { %2396 = vperm.xlu0 %3435, %v3452_v38  }
 0x7f8   : > { %v2376_v59 = vpop.permute.xlu0 %2375 }
 0x7f9   : > { %v2401_v18 = vrot.slane %v2376_v59, %v4649_v10 }
 0x7fc   : > { %v2379_v32 = vpop.permute.xlu0 %2378 }
 0x7fd   : > { %v2405_v21 = vrot.slane %v2379_v32, %v4643_v34 }
 0x7ff   : > { %v2406_v35 = vsel %vm2289_vm13, %v2405_v21, %v2401_v18 }
 0x800   : > { %v2388_v22 = vpop.permute.xlu0 %2387 }
 0x801   : > { %v2420_v54 = vrot.slane %v2388_v22, %v4649_v10 }
 0x804   : > { %v2391_v2 = vpop.permute.xlu0 %2390 }
 0x805   : > { %v2424_v48 = vrot.slane %v2391_v2, %v4643_v34 }
 0x807   : > { %v2425_v6 = vsel %vm2289_vm13, %v2424_v48, %v2420_v54 }
 0x808   : > { %v2382_v62 = vpop.permute.xlu0 %2381 }
 0x809   : > { %v2410_v41 = vrot.slane %v2382_v62, %v4646_v24 }
 0x80b   : > { %v2411_v51 = vsel %vm2296_vm14, %v2410_v41, %v2406_v35 }
 0x80c   : > { %v2394_v25 = vpop.permute.xlu0 %2393 }
 0x80d   : > { %v2429_v12 = vrot.slane %v2394_v25, %v4646_v24 }
 0x80f   : > { %v2430_v34 = vsel %vm2296_vm14, %v2429_v12, %v2425_v6 }
 0x810   : > { %v2385_v27 = vpop.permute.xlu0 %2384 }
 0x811   : > { %v2415_v58 = vrot.slane %v2385_v27, %v4652_v28 }
 0x813   : > { %v2416_v7 = vsel %vm2303_vm15, %v2415_v58, %v2411_v51 }
 0x814   : > { %v2397_v56 = vpop.permute.xlu0 %2396 }
 0x815   : > { %v2434_v50 = vrot.slane %v2397_v56, %v4652_v28 }
 0x817   : > { %v2435_v24 = vsel %vm2303_vm15, %v2434_v50, %v2430_v34 }
 0x818   : > { %v2436_v16 = vsel %vm2324_vm0, %v2435_v24, %v2416_v7 }
 0x819   : > { %v2438_v10 = vsel %vm2327_vm1, %v2436_v16, 0.0 }
 0x81a   : > { %2439 = vadd.xlane.f32.xlu0 %v2438_v10 }
 0x8a7   : > { %v2440_v47 = vpop.xlane.xlu0 %2439 }
 0x8a8   : > { %3453 = vrcp.f32 %v2440_v47 }
 0x8b2   : > { %v3454_v29 = vpop.eup %3453 }
 0x8b3   : > { %v2446_v55 = vrot.slane %v3454_v29, %v4880_v15  ;;  %v2450_v28 = vrot.slane %v3454_v29, %v4881_v11 }
 0x8b5   : > { %v2459_v40 = vmul.f32 %v3448_v61, %v2450_v28  ;;  %v2453_v31 = vmul.f32 %v3438_v8, %v2446_v55  ;;  %v2454_v44 = vmul.f32 %v3440_v9, %v2446_v55  ;;  %v2457_v63 = vmul.f32 %v3442_v49, %v2450_v28 }
 0x8b6   : > { %v2458_v39 = vmul.f32 %v3444_v33, %v2450_v28  ;;  %v2455_v20 = vmul.f32 %v3446_v53, %v2446_v55  ;;  %v2456_v17 = vmul.f32 %v3450_v57, %v2446_v55  ;;  %v2460_v37 = vmul.f32 %v3452_v38, %v2450_v28 }
 0x8b7   : > { %2493 = vperm.xlu0 %3435, %v2459_v40   ;;  %2463 = vperm.xlu1 %3436, %v2453_v31  }
 0x8bb   : > { %2468 = vperm.xlu1 %3436, %v2454_v44  }
 0x8bf   : > { %2483 = vperm.xlu1 %3436, %v2457_v63  }
 0x8c3   : > { %2488 = vperm.xlu1 %3436, %v2458_v39  }
 0x8c7   : > { %2473 = vperm.xlu1 %3436, %v2455_v20  }
 0x8cb   : > { %2478 = vperm.xlu1 %3436, %v2456_v17  }
 0x8cf   : > { %2498 = vperm.xlu1 %3436, %v2460_v37  }
 0x936   : > { %v2464_v3 = vpop.permute.xlu1 %2463  ;;  %v2494_v49 = vpop.permute.xlu0 %2493 }
 0x937   : > { %v2501_v0 = vmul.f32 %v2464_v3, %v4562_v36  ;;  %v2507_v53 = vmul.f32 %v2494_v49, %v4575_v30 }
 0x93a   : > { %v2469_v15 = vpop.permute.xlu1 %2468 }
 0x93b   : > { %v2502_v43 = vmul.f32 %v2469_v15, %v4566_v46 }
 0x93d   : > { %v2509_v1 = vadd.f32 %v2502_v43, %v2501_v0 }
 0x93e   : > { %v2484_v42 = vpop.permute.xlu1 %2483 }
 0x93f   : > { %v2505_v26 = vmul.f32 %v2484_v42, %v4569_v60 }
 0x942   : > { %v2489_v11 = vpop.permute.xlu1 %2488 }
 0x943   : > { %v2506_v52 = vmul.f32 %v2489_v11, %v4572_v5 }
 0x945   : > { %v2518_v19 = vadd.f32 %v2506_v52, %v2505_v26 }
 0x946   : > { %v2474_v8 = vpop.permute.xlu1 %2473 }
 0x947   : > { %v2503_v9 = vmul.f32 %v2474_v8, %v4554_v4  ;;  %v2519_v36 = vadd.f32 %v2518_v19, %v2507_v53 }
 0x949   : > { %v2510_v33 = vadd.f32 %v2509_v1, %v2503_v9 }
 0x94a   : > { %v2479_v13 = vpop.permute.xlu1 %2478 }
 0x94b   : > { %v2504_v14 = vmul.f32 %v2479_v13, %v4558_v23 }
 0x94d   : > { %v2511_v46 = vadd.f32 %v2510_v33, %v2504_v14 }
 0x94e   : > { %v2499_v61 = vpop.permute.xlu1 %2498 }
 0x94f   : > { %v2512_v57 = vrot.slane %v2511_v46, 4  ;;  %v2508_v5 = vmul.f32 %v2499_v61, %v4578_v45 }
 0x951   : > { %v2513_v4 = vadd.f32 %v2512_v57, %v2511_v46  ;;  %v2520_v38 = vadd.f32 %v2519_v36, %v2508_v5 }
 0x953   : > { %v2514_v59 = vrot.slane %v2513_v4, 2  ;;  %v2521_v60 = vrot.slane %v2520_v38, 4 }
 0x955   : > { %v2515_v32 = vadd.f32 %v2514_v59, %v2513_v4  ;;  %v2522_v22 = vadd.f32 %v2521_v60, %v2520_v38 }
 0x957   : > { %v2516_v2 = vrot.slane %v2515_v32, 1  ;;  %v2523_v62 = vrot.slane %v2522_v22, 2 }
 0x959   : > { %v2517_v25 = vadd.f32 %v2516_v2, %v2515_v32  ;;  %v2524_v23 = vadd.f32 %v2523_v62, %v2522_v22 }
 0x95b   : > { %2535 = vst [vmem:[%s4005_s23] sm:$0x1] %v2517_v25  ;;  %v2525_v30 = vrot.slane %v2524_v23, 1 }
 0x95d   : > { %v2526_v27 = vadd.f32 %v2525_v30, %v2524_v23 }
 0x95f   : > { %2536 = vst [vmem:[%s4005_s23 + $0x1] sm:$0x1] %v2526_v27 }
 0x960 PF: > { %s4882_s26 = sld [smem:[#allocation23_spill]]  ;;  %s2914_s21 = sshll.u32 %s3661_s27, 10 }
 0x961   : > { %s4883_s11 = sld [smem:[#allocation36_spill]]  ;;  %s2557_s29 = sshll.u32 %s4003_s28, 4  ;;  %s4715_s29 = int_to_ptr.vmem [resolvable:$true] %s2557_s29 }
 0x962   : > { %s2538_s17 = scalar_lea.sflag [#allocation6], %s3918_s16  ;;  %s3539_s12 = scalar_lea.vmem %s4715_s29, 1024 }
 0x963   : > { %p3540_p1 = scmp.ne.s32.totalorder %s4715_s29, %s3539_s12  ;;  %s3687_s18 = smov [#allocation10]  }
 0x964   : > { %s3543_s20 = sshll.u32 %s3687_s18, 4  ;;  %s3544_s20 = int_to_ptr.vmem [resolvable:$false] %s3543_s20 }
 0x965   : > { %s3545_s22 = scalar_lea.vmem %s3544_s20, 2048  ;;  %p3546_p7 = scmp.lt.s32.totalorder %s4715_s29, %s3544_s20 }
 0x966   : > { %p4884_p4 = scmp.ne.s32.totalorder %s4882_s26, 0  ;;  %p3547_p8 = scmp.lt.s32.totalorder %s3545_s22, %s3539_s12 }
 0x967   : > { %s4712_s13 = scalar_lea.hbm %s4883_s11, %s2914_s21 }
 0x968   : > { %p3541_p5 = pnand %p3540_p1, %p4884_p4  ;;  %p3548_p11 = por %p3547_p8, %p3546_p7 }
 0x96a   : > { %p3542_p6 = pneg %p3541_p5 }
 0x96c   : > { %p3549_p12 = pnand %p3548_p11, %p3542_p6 }
 0x96e   : > { %3552 = shalt.err (!%p3549_p12)
}
 0x96f   : > { %s3553_s30 = scalar_lea.hbm %s4712_s13, 1024  ;;  %s3557_s19 = scalar_lea.hbm %s4883_s11, 4096 }
 0x970   : > { %p3554_p3 = scmp.ne.s32.totalorder %s4712_s13, %s3553_s30  ;;  %p3558_p2 = scmp.lt.u32.totalorder %s4712_s13, %s4883_s11 }
 0x971   : > { %p3559_p10 = scmp.lt.u32.totalorder %s3557_s19, %s3553_s30  ;;  %p3561_p1 = scmp.lt.u32.totalorder %s3553_s30, %s4712_s13 }
 0x972   : > { %p3555_p9 = pnand %p3554_p3, %p4884_p4 }
 0x973   : > { %p3560_p13 = por %p3559_p10, %p3558_p2 }
 0x974   : > { %p3556_p0 = pneg %p3555_p9 }
 0x975   : > { %p3562_p5 = por %p3561_p1, %p3560_p13 }
 0x977   : > { %p3563_p6 = pnand %p3562_p5, %p3556_p0 }
 0x979   : > { %3566 = shalt.err (!%p3563_p6)
}
 0x97a   : > { %s3688_s14 = smov 128   ;;  %s3689_s10 = smov 8  }
 0x97b   : > { %3199 = dma.vmem_to_hbm [thread:$0]  (%p4884_p4), %s4715_s29, 1024, %s4712_s13, %s2538_s17, %s3688_s14, %s3688_s14, %s3689_s10  }
 0x97c   : > { %s2915_s12 = sshll.u32 %s3661_s27, 5  ;;  %s2573_s18 = sshll.u32 %s4005_s23, 4  ;;  %s4748_s18 = int_to_ptr.vmem [resolvable:$true] %s2573_s18 }
 0x97d   : > { %s4885_s30 = sld [smem:[#allocation37_spill]]  ;;  %s2543_s28 = scalar_lea.sflag [#allocation12], %s3918_s16 }
 0x97e   : > { %s3567_s19 = scalar_lea.vmem %s4748_s18, 32  ;;  %s3690_s25 = smov [#allocation11]  }
 0x97f   : > { %p3568_p7 = scmp.ne.s32.totalorder %s4748_s18, %s3567_s19  ;;  %s3571_s13 = sshll.u32 %s3690_s25, 4  ;;  %s3572_s13 = int_to_ptr.vmem [resolvable:$false] %s3571_s13 }
 0x980   : > { %s3573_s27 = scalar_lea.vmem %s3572_s13, 64  ;;  %p3574_p12 = scmp.lt.s32.totalorder %s4748_s18, %s3572_s13 }
 0x981   : > { %p3569_p8 = pnand %p3568_p7, %p4884_p4  ;;  %p3575_p3 = scmp.lt.s32.totalorder %s3573_s27, %s3567_s19 }
 0x983   : > { %s4746_s15 = scalar_lea.hbm %s4885_s30, %s2915_s12  ;;  %p3570_p11 = pneg %p3569_p8 }
 0x984   : > { %p3576_p9 = por %p3575_p3, %p3574_p12 }
 0x986   : > { %p3577_p0 = pnand %p3576_p9, %p3570_p11 }
 0x988   : > { %3580 = shalt.err (!%p3577_p0)
}
 0x989   : > { %s3581_s23 = scalar_lea.hbm %s4746_s15, 32  ;;  %s3585_s21 = scalar_lea.hbm %s4885_s30, 128 }
 0x98a   : > { %p3582_p2 = scmp.ne.s32.totalorder %s4746_s15, %s3581_s23  ;;  %p3586_p1 = scmp.lt.u32.totalorder %s4746_s15, %s4885_s30 }
 0x98b   : > { %p3587_p5 = scmp.lt.u32.totalorder %s3585_s21, %s3581_s23  ;;  %p3589_p7 = scmp.lt.u32.totalorder %s3581_s23, %s4746_s15 }
 0x98c   : > { %p3583_p10 = pnand %p3582_p2, %p4884_p4 }
 0x98d   : > { %p3588_p6 = por %p3587_p5, %p3586_p1 }
 0x98e   : > { %p3584_p13 = pneg %p3583_p10 }
 0x98f   : > { %p3590_p8 = por %p3589_p7, %p3588_p6 }
 0x991   : > { %p3591_p11 = pnand %p3590_p8, %p3584_p13 }
 0x993   : > { %3594 = shalt.err (!%p3591_p11)
}
 0x994   : > { %s3691_s12 = smov 16   ;;  %s3692_s20 = smov 1  }
 0x995   : > { %3200 = dma.vmem_to_hbm [thread:$0]  (%p4884_p4), %s4748_s18, 32, %s4746_s15, %s2543_s28, %s3691_s12, %s3691_s12, %s3692_s20  }
 0x996 PF: > { %s4886_s22 = sld [smem:[#allocation21_spill]]  ;;  %s4887_s19 = sld [smem:[#allocation17_spill]] }
 0x997   : > { %s4888_s25 = sld [smem:[#allocation25_spill]] }
 0x99c   : > { %p3226_p12 = scmp.ge.s32.totalorder %s4886_s22, 2  ;;  %s2588_s13 = sand.u32 1, %s4887_s19  }
 0x99d   : > { %p4889_p3 = scmp.ne.s32.totalorder %s4888_s25, 0  ;;  %s2589_s27 = scalar_lea.sflag [#allocation6], %s2588_s13 }
 0x99f   : > { %p3214_p9 = pnand %p3226_p12, %p4889_p3 }
 0x9a1   : > { %3636 = dma.done.wait (!%p3214_p9), %s2589_s27, 1024  }
 0x9a2   : > { %3638 = vsyncadd (!%p3214_p9), %s2589_s27, 4294966272  ;;  %s2598_s23 = scalar_lea.sflag [#allocation12], %s2588_s13 }
 0x9a3   : > { %3640 = dma.done.wait (!%p3214_p9), %s2598_s23, 32  }
 0x9a4   : > { %3642 = vsyncadd (!%p3214_p9), %s2598_s23, 4294967264  ;;  %s33_s29 = sadd.s32 1, %s4886_s22   ;;  %s4890_s16 = sld [smem:[#allocation18_spill]] }
 0x9a5   : > { %p30_p0 = scmp.ge.s32.totalorder %s33_s29, 10   ;;  %s4891_s25 = sld [smem:[#allocation26_spill]] }
 0x9a6   : > { %s4892_s26 = sld [smem:[#allocation19_spill]]  ;;  %s4893_s27 = sld [smem:[#allocation20_spill]] }
 0x9a7   : > { %s4894_s28 = sld [smem:[#allocation22_spill]]  ;;  %s4895_s10 = sld [smem:[#allocation24_spill]] }
 0x9a8   : > { %s4896_s23 = smov %s3649_s24  ;;  %32 = sbr.rel (!%p30_p0) target bundleno = 12 (0xc), region = 153 }
 0x9aa   : > { %s4897_s24 = smov %s4890_s16 }
 0x9af   :  { %2603 = vsyncpa [#allocation5], 1 }
 0x9b0   :  { %2605 = vsyncpa [#allocation5 + $0x1], 1 }
 0x9b1   :  { %2606 = vsyncpa [#allocation8], 1 }
 0x9b2   :  { %2607 = vsyncpa [#allocation6], 1 }
 0x9b3   :  { %2609 = vsyncpa [#allocation6 + $0x1], 1 }
 0x9b4   :  { %2610 = vsyncpa [#allocation12], 1 }
 0x9b5   :  { %2612 = vsyncpa [#allocation12 + $0x1], 1 }

</bundles_post_ra>
